<compile_context>
chip_gen: v6e
topology: v6e:2x2x1
jax: 0.10.0
libtpu: 0.0.40
codegen_flags: <defaults>
</compile_context>

<pallas_src>
import functools
import math

import jax
import jax.numpy as jnp
from jax.experimental import pallas as pl
from jax.experimental.pallas import tpu as pltpu


def _round_up(x, m):
    return (x + m - 1) // m * m


# ----------------------------------------------------------------------------
# Pallas kernel 1: tiled fused  out = act(A @ W + b)
# ----------------------------------------------------------------------------
def _mm_bias_act_kernel(a_ref, w_ref, b_ref, o_ref, acc_ref, *, act):
    k = pl.program_id(2)

    @pl.when(k == 0)
    def _():
        acc_ref[...] = jnp.zeros_like(acc_ref)

    acc_ref[...] += jnp.dot(a_ref[...], w_ref[...],
                            preferred_element_type=jnp.float32)

    @pl.when(k == pl.num_programs(2) - 1)
    def _():
        out = acc_ref[...] + b_ref[...]
        if act == "relu":
            out = jnp.maximum(out, 0.0)
        elif act == "tanh":
            out = jnp.tanh(out)
        o_ref[...] = out.astype(o_ref.dtype)


def matmul_bias_act(a, w, b, act=None, *, tm_cap=512, tn=128, tk=128):
    """a:(M,K) w:(K,N) b:(N,) -> (M,N) f32.  Tiled / pipelined / bf16 MXU feed.

    K, N are zero-padded to multiples of 128 (lane-dense stores, full-width
    MXU); M is padded to a sublane-aligned tile.  Accumulation in f32 VMEM.
    Note: on v6e tk/tn could be bumped to 256 and tm_cap raised; on v7x keep
    tiles within the 64 MiB VMEM budget.
    """
    M, K = a.shape
    K2, N = w.shape
    assert K == K2, (K, K2)

    tm = min(tm_cap, _round_up(M, 8))
    Mp = _round_up(M, tm)
    Kp = _round_up(K, tk)
    Np = _round_up(N, tn)

    a_p = jnp.pad(a.astype(jnp.float32), ((0, Mp - M), (0, Kp - K))).astype(jnp.bfloat16)
    w_p = jnp.pad(w.astype(jnp.float32), ((0, Kp - K), (0, Np - N))).astype(jnp.bfloat16)
    b_p = jnp.pad(b.astype(jnp.float32), (0, Np - N)).reshape(1, Np)

    grid = (Mp // tm, Np // tn, Kp // tk)
    flops = 2 * Mp * Np * Kp
    bytes_accessed = Mp * Kp * 2 + Kp * Np * 2 + Np * 4 + Mp * Np * 4
    transcendentals = Mp * Np if act == "tanh" else 0

    out = pl.pallas_call(
        functools.partial(_mm_bias_act_kernel, act=act),
        out_shape=jax.ShapeDtypeStruct((Mp, Np), jnp.float32),
        grid_spec=pltpu.PrefetchScalarGridSpec(
            num_scalar_prefetch=0,
            grid=grid,
            in_specs=[
                pl.BlockSpec((tm, tk), lambda i, j, kk: (i, kk)),
                pl.BlockSpec((tk, tn), lambda i, j, kk: (kk, j)),
                pl.BlockSpec((1, tn), lambda i, j, kk: (0, j)),
            ],
            out_specs=pl.BlockSpec((tm, tn), lambda i, j, kk: (i, j)),
            scratch_shapes=[pltpu.VMEM((tm, tn), jnp.float32)],
        ),
        compiler_params=pltpu.CompilerParams(
            dimension_semantics=("parallel", "parallel", "arbitrary"),
            vmem_limit_bytes=32 * 1024 * 1024,
        ),
        cost_estimate=pl.CostEstimate(
            flops=flops,
            transcendentals=transcendentals,
            bytes_accessed=bytes_accessed,
        ),
    )(a_p, w_p, b_p)
    return out[:M, :N]


# ----------------------------------------------------------------------------
# Pallas kernel 2: fused separable bilinear upsample  Y = Wh @ X @ Ww^T per slab
# ----------------------------------------------------------------------------
def _bilinear_kernel(x_ref, wh_ref, wwt_ref, o_ref, *, nb):
    wh = wh_ref[...]
    wwt = wwt_ref[...]
    for s in range(nb):                       # static unrolled loop over slabs
        t = jnp.dot(wh, x_ref[s], preferred_element_type=jnp.float32)
        o_ref[s] = jnp.dot(t, wwt, preferred_element_type=jnp.float32)


def _bilinear_matrix(out_size, in_size):
    """Interpolation matrix (out_size, in_size), align_corners=False.
    NOTE: clip of src BEFORE lambda matches PyTorch's negative-coord clamp."""
    scale = in_size / out_size
    dst = jnp.arange(out_size, dtype=jnp.float32)
    src = jnp.clip((dst + 0.5) * scale - 0.5, 0.0, float(in_size - 1))
    i0 = jnp.clip(jnp.floor(src).astype(jnp.int32), 0, in_size - 1)
    i1 = jnp.minimum(i0 + 1, in_size - 1)
    lam = src - i0.astype(jnp.float32)
    W = (jax.nn.one_hot(i0, in_size, dtype=jnp.float32) * (1.0 - lam)[:, None]
         + jax.nn.one_hot(i1, in_size, dtype=jnp.float32) * lam[:, None])
    return W


def bilinear_resize(x, h_out, w_out):
    """x: (N, Hin, Win) -> (N, h_out, w_out). Both contractions fused in one
    Pallas kernel; the (h_out, Win) intermediate never touches HBM."""
    N, Hin, Win = x.shape
    Wh = _bilinear_matrix(h_out, Hin)            # (h_out, Hin)
    WwT = _bilinear_matrix(w_out, Win).T         # (Win, w_out)
    nb = math.gcd(N, 8)                          # slabs per grid step
    grid = (N // nb,)
    flops = N * 2 * (h_out * Hin * Win + h_out * Win * w_out)
    bytes_accessed = 4 * (N * Hin * Win + N * h_out * w_out
                          + h_out * Hin + Win * w_out)

    return pl.pallas_call(
        functools.partial(_bilinear_kernel, nb=nb),
        out_shape=jax.ShapeDtypeStruct((N, h_out, w_out), jnp.float32),
        grid_spec=pltpu.PrefetchScalarGridSpec(
            num_scalar_prefetch=0,
            grid=grid,
            in_specs=[
                pl.BlockSpec((nb, Hin, Win), lambda n: (n, 0, 0)),
                pl.BlockSpec((h_out, Hin), lambda n: (0, 0)),
                pl.BlockSpec((Win, w_out), lambda n: (0, 0)),
            ],
            out_specs=pl.BlockSpec((nb, h_out, w_out), lambda n: (n, 0, 0)),
        ),
        compiler_params=pltpu.CompilerParams(
            dimension_semantics=("parallel",),
            vmem_limit_bytes=32 * 1024 * 1024,
        ),
        cost_estimate=pl.CostEstimate(
            flops=flops, transcendentals=0, bytes_accessed=bytes_accessed),
    )(x.astype(jnp.float32), Wh, WwT)


# ----------------------------------------------------------------------------
# Conv via im2col + the tiled Pallas matmul
# ----------------------------------------------------------------------------
def _im2col(x_nhwc, kh, kw, stride, pad):
    B, H, W, C = x_nhwc.shape
    xp = jnp.pad(x_nhwc, ((0, 0), (pad, pad), (pad, pad), (0, 0)))
    Ho = (H + 2 * pad - kh) // stride + 1
    Wo = (W + 2 * pad - kw) // stride + 1
    cols = []
    for dh in range(kh):
        for dw in range(kw):
            cols.append(xp[:, dh:dh + Ho * stride:stride, dw:dw + Wo * stride:stride, :])
    patches = jnp.concatenate(cols, axis=-1)      # (B, Ho, Wo, kh*kw*C)
    return patches.reshape(B * Ho * Wo, kh * kw * C), (B, Ho, Wo)


def conv2d(x_nhwc, w, b, *, stride, pad, act=None):
    """w: (kh, kw, Cin, Cout), b: (Cout,). Matmul+bias+act fused in Pallas."""
    # TODO(synk): at production resolutions replace HBM im2col with an in-kernel
    # halo-row-tile DMA + 9 shifted matmuls to avoid the 9x patch expansion.
    kh, kw, cin, cout = w.shape
    patches, (B, Ho, Wo) = _im2col(x_nhwc, kh, kw, stride, pad)
    out = matmul_bias_act(patches, w.reshape(kh * kw * cin, cout), b, act)
    return out.reshape(B, Ho, Wo, cout)


# ----------------------------------------------------------------------------
# Deterministic synthetic parameters (not a checkpoint)
# ----------------------------------------------------------------------------
def init_params(key, c_in=4, c_enc=8, c_dec=16, n_classes=3):
    ks = jax.random.split(key, 6)

    def conv_init(kw_, kb_, kh, kwid, ci, co):
        fan_in = kh * kwid * ci
        w = jax.random.normal(kw_, (kh, kwid, ci, co), jnp.float32) / math.sqrt(fan_in)
        b = 0.01 * jax.random.normal(kb_, (co,), jnp.float32)
        return w, b

    enc_w, enc_b = conv_init(ks[0], ks[1], 3, 3, c_in, c_enc)
    dec_w, dec_b = conv_init(ks[2], ks[3], 3, 3, c_enc, c_dec)
    head_w, head_b = conv_init(ks[4], ks[5], 3, 3, c_dec, n_classes)
    return dict(enc_w=enc_w, enc_b=enc_b,
                dec_w=dec_w, dec_b=dec_b,
                head_w=head_w, head_b=head_b)


# ----------------------------------------------------------------------------
# SegmentationModel.forward
# ----------------------------------------------------------------------------
@functools.partial(jax.jit, static_argnames=("apply_tanh",))
def _forward_impl(params, x_nchw, apply_tanh):
    B, C, H, W = x_nchw.shape
    x_nhwc = jnp.transpose(x_nchw, (0, 2, 3, 1)).astype(jnp.float32)

    # encoder(x) -> multi-scale features (deepest is last)
    f1 = conv2d(x_nhwc, params["enc_w"], params["enc_b"], stride=2, pad=1, act="relu")
    features = (x_nhwc, f1)

    # decoder(*features)
    dec = conv2d(features[-1], params["dec_w"], params["dec_b"], stride=1, pad=1, act="relu")

    # F.interpolate(decoder_output, size=x.shape[2:], mode='bilinear')
    Bd, Hd, Wd, Cd = dec.shape
    dec_cf = jnp.transpose(dec, (0, 3, 1, 2)).reshape(Bd * Cd, Hd, Wd)
    up = bilinear_resize(dec_cf, H, W)                       # (B*Cd, H, W)
    up_nhwc = jnp.transpose(up.reshape(B, Cd, H, W), (0, 2, 3, 1))
    # TODO(synk): fuse the segmentation head into the upsample kernel so up_nhwc
    # never round-trips HBM (largest intermediate at full resolution).

    # segmentation_head(decoder_output); tanh fused when outs_dict path is taken
    act = "tanh" if apply_tanh else None
    masks_nhwc = conv2d(up_nhwc, params["head_w"], params["head_b"], stride=1, pad=1, act=act)
    return jnp.transpose(masks_nhwc, (0, 3, 1, 2))           # back to NCHW


def segmentation_forward(params, x_nchw, outs_dict=None):
    masks = _forward_impl(params, x_nchw, outs_dict is not None)
    if outs_dict is not None:
        out_imgs = {key: masks for key in outs_dict.keys()}  # tanh(masks) per key
        return (out_imgs,)
    # TODO(synk): classification_head is None in this instantiation; 'aux' branch omitted.
    return {"out": masks}


if __name__ == "__main__":
    key = jax.random.PRNGKey(0)
    kx, kp = jax.random.split(key)
    x = jax.random.normal(kx, (2, 4, 16, 16), jnp.float32)    # NCHW
    params = init_params(kp)

    # branch 1: outs_dict is None -> {'out': masks}
    out_plain = segmentation_forward(params, x, outs_dict=None)
    masks = jax.block_until_ready(out_plain["out"])
    assert masks.shape == (2, 3, 16, 16) and masks.dtype == jnp.float32

    # branch 2: outs_dict provided -> ({key: tanh(masks)}, )
    out_dict = segmentation_forward(params, x, outs_dict={"rec": None})
    rec = jax.block_until_ready(out_dict[0]["rec"])
    assert rec.shape == (2, 3, 16, 16)
    assert bool(jnp.all(jnp.abs(rec) <= 1.0))                 # tanh range check

    print("KERNEL_OK")
</pallas_src>

<mosaic_0001>
module attributes {stable_mosaic.version = 11 : i64} {
  func.func @_mm_bias_act_kernel(%arg0: i32, %arg1: i32, %arg2: i32, %arg3: memref<128x128xbf16, #tpu.memory_space<vmem>>, %arg4: memref<128x128xbf16, #tpu.memory_space<vmem>>, %arg5: memref<1x128xf32, #tpu.memory_space<vmem>>, %arg6: memref<128x128xf32, #tpu.memory_space<vmem>>, %arg7: memref<128x128xf32, #tpu.memory_space<vmem>>) attributes {dimension_semantics = [#tpu.dimension_semantics<parallel>, #tpu.dimension_semantics<parallel>, #tpu.dimension_semantics<arbitrary>], iteration_bounds = array<i64: 1, 1, 1>, scalar_prefetch = 0 : i64, scratch_operands = 1 : i64, tpu.core_type = #tpu.core_type<tc>, window_params = [{transform_indices = @transform_0, window_bounds = array<i64: 128, 128>}, {transform_indices = @transform_1, window_bounds = array<i64: 128, 128>}, {transform_indices = @transform_2, window_bounds = array<i64: 1, 128>}, {transform_indices = @transform_3, window_bounds = array<i64: 128, 128>}]} {
    %c0_i32 = arith.constant 0 : i32
    %0 = arith.cmpi eq, %arg2, %c0_i32 : i32
    %1 = arith.extui %0 : i1 to i32
    %c0_i32_0 = arith.constant 0 : i32
    %2 = arith.cmpi ne, %1, %c0_i32_0 : i32
    scf.if %2 {
      %cst_10 = arith.constant 0.000000e+00 : f32
      %12 = vector.broadcast %cst_10 : f32 to vector<128x128xf32>
      %c0_11 = arith.constant 0 : index
      %c0_12 = arith.constant 0 : index
      %13 = vector.load %arg7[%c0_11, %c0_12] : memref<128x128xf32, #tpu.memory_space<vmem>>, vector<128x128xf32>
      tpu.vector_store %arg7[%c0_11, %c0_12], %12 {strides = array<i32>} : memref<128x128xf32, #tpu.memory_space<vmem>>, vector<128x128xf32>,
    } else {
    }
    %c0 = arith.constant 0 : index
    %c0_1 = arith.constant 0 : index
    %3 = vector.load %arg7[%c0, %c0_1] : memref<128x128xf32, #tpu.memory_space<vmem>>, vector<128x128xf32>
    %c0_2 = arith.constant 0 : index
    %c0_3 = arith.constant 0 : index
    %4 = vector.load %arg3[%c0_2, %c0_3] : memref<128x128xbf16, #tpu.memory_space<vmem>>, vector<128x128xbf16>
    %c0_4 = arith.constant 0 : index
    %c0_5 = arith.constant 0 : index
    %5 = vector.load %arg4[%c0_4, %c0_5] : memref<128x128xbf16, #tpu.memory_space<vmem>>, vector<128x128xbf16>
    %cst = arith.constant dense<0.000000e+00> : vector<128x128xf32>
    %6 = tpu.matmul %4, %5, %cst {dimension_numbers = #tpu.dot_dimension_numbers<[1], [0], [0], [1], [0, 0, 1, 1], [], []>} : vector<128x128xbf16>, vector<128x128xbf16>, vector<128x128xf32> -> vector<128x128xf32>
    %7 = arith.addf %3, %6 : vector<128x128xf32>
    %c0_6 = arith.constant 0 : index
    %c0_7 = arith.constant 0 : index
    %8 = vector.load %arg7[%c0_6, %c0_7] : memref<128x128xf32, #tpu.memory_space<vmem>>, vector<128x128xf32>
    tpu.vector_store %arg7[%c0_6, %c0_7], %7 {strides = array<i32>} : memref<128x128xf32, #tpu.memory_space<vmem>>, vector<128x128xf32>,
    %c0_i32_8 = arith.constant 0 : i32
    %9 = arith.cmpi eq, %arg2, %c0_i32_8 : i32
    %10 = arith.extui %9 : i1 to i32
    %c0_i32_9 = arith.constant 0 : i32
    %11 = arith.cmpi ne, %10, %c0_i32_9 : i32
    scf.if %11 {
      %c0_10 = arith.constant 0 : index
      %c0_11 = arith.constant 0 : index
      %12 = vector.load %arg7[%c0_10, %c0_11] : memref<128x128xf32, #tpu.memory_space<vmem>>, vector<128x128xf32>
      %c0_12 = arith.constant 0 : index
      %c0_13 = arith.constant 0 : index
      %13 = vector.load %arg5[%c0_12, %c0_13] : memref<1x128xf32, #tpu.memory_space<vmem>>, vector<1x128xf32>
      %14 = vector.broadcast %13 : vector<1x128xf32> to vector<128x128xf32>
      %15 = arith.addf %12, %14 : vector<128x128xf32>
      %cst_14 = arith.constant 0.000000e+00 : f32
      %16 = vector.broadcast %cst_14 : f32 to vector<128x128xf32>
      %17 = arith.maximumf %15, %16 : vector<128x128xf32>
      %c0_15 = arith.constant 0 : index
      %c0_16 = arith.constant 0 : index
      %18 = vector.load %arg6[%c0_15, %c0_16] : memref<128x128xf32, #tpu.memory_space<vmem>>, vector<128x128xf32>
      tpu.vector_store %arg6[%c0_15, %c0_16], %17 {strides = array<i32>} : memref<128x128xf32, #tpu.memory_space<vmem>>, vector<128x128xf32>,
    } else {
    }
    return
  }
  func.func @transform_0(%arg0: i32, %arg1: i32, %arg2: i32) -> (i32, i32) {
    %c0_i32 = arith.constant 0 : i32
    return %arg0, %arg2 : i32, i32
  }
  func.func @transform_1(%arg0: i32, %arg1: i32, %arg2: i32) -> (i32, i32) {
    %c0_i32 = arith.constant 0 : i32
    return %arg2, %arg1 : i32, i32
  }
  func.func @transform_2(%arg0: i32, %arg1: i32, %arg2: i32) -> (i32, i32) {
    %c0_i32 = arith.constant 0 : i32
    %c0_i32_0 = arith.constant 0 : i32
    return %c0_i32, %arg1 : i32, i32
  }
  func.func @transform_3(%arg0: i32, %arg1: i32, %arg2: i32) -> (i32, i32) {
    %c0_i32 = arith.constant 0 : i32
    return %arg0, %arg1 : i32, i32
  }
}

module attributes {stable_mosaic.version = 11 : i64} {
  func.func @_bilinear_kernel(%arg0: i32, %arg1: memref<8x8x8xf32, #tpu.memory_space<vmem>>, %arg2: memref<16x8xf32, #tpu.memory_space<vmem>>, %arg3: memref<8x16xf32, #tpu.memory_space<vmem>>, %arg4: memref<8x16x16xf32, #tpu.memory_space<vmem>>) attributes {dimension_semantics = [#tpu.dimension_semantics<parallel>], iteration_bounds = array<i64: 4>, scalar_prefetch = 0 : i64, scratch_operands = 0 : i64, tpu.core_type = #tpu.core_type<tc>, window_params = [{transform_indices = @transform_0, window_bounds = array<i64: 8, 8, 8>}, {pipeline_mode = #tpu.pipeline_mode<synchronous>, transform_indices = @transform_1, window_bounds = array<i64: 16, 8>}, {pipeline_mode = #tpu.pipeline_mode<synchronous>, transform_indices = @transform_2, window_bounds = array<i64: 8, 16>}, {transform_indices = @transform_3, window_bounds = array<i64: 8, 16, 16>}]} {
    %c0 = arith.constant 0 : index
    %c0_0 = arith.constant 0 : index
    %0 = vector.load %arg2[%c0, %c0_0] : memref<16x8xf32, #tpu.memory_space<vmem>>, vector<16x8xf32>
    %c0_1 = arith.constant 0 : index
    %c0_2 = arith.constant 0 : index
    %1 = vector.load %arg3[%c0_1, %c0_2] : memref<8x16xf32, #tpu.memory_space<vmem>>, vector<8x16xf32>
    %c0_3 = arith.constant 0 : index
    %c0_4 = arith.constant 0 : index
    %c0_5 = arith.constant 0 : index
    %2 = vector.load %arg1[%c0_3, %c0_4, %c0_5] : memref<8x8x8xf32, #tpu.memory_space<vmem>>, vector<1x8x8xf32>
    %3 = vector.shape_cast %2 : vector<1x8x8xf32> to vector<8x8xf32>
    %cst = arith.constant dense<0.000000e+00> : vector<16x8xf32>
    %4 = tpu.matmul %0, %3, %cst {dimension_numbers = #tpu.dot_dimension_numbers<[1], [0], [0], [1], [0, 0, 1, 1], [], []>} : vector<16x8xf32>, vector<8x8xf32>, vector<16x8xf32> -> vector<16x8xf32>
    %cst_6 = arith.constant dense<0.000000e+00> : vector<16x16xf32>
    %5 = tpu.matmul %4, %1, %cst_6 {dimension_numbers = #tpu.dot_dimension_numbers<[1], [0], [0], [1], [0, 0, 1, 1], [], []>} : vector<16x8xf32>, vector<8x16xf32>, vector<16x16xf32> -> vector<16x16xf32>
    %c0_7 = arith.constant 0 : index
    %c0_8 = arith.constant 0 : index
    %c0_9 = arith.constant 0 : index
    %6 = vector.load %arg4[%c0_7, %c0_8, %c0_9] : memref<8x16x16xf32, #tpu.memory_space<vmem>>, vector<1x16x16xf32>
    %7 = vector.shape_cast %6 : vector<1x16x16xf32> to vector<16x16xf32>
    %8 = vector.shape_cast %5 : vector<16x16xf32> to vector<1x16x16xf32>
    tpu.vector_store %arg4[%c0_7, %c0_8, %c0_9], %8 {strides = array<i32>} : memref<8x16x16xf32, #tpu.memory_space<vmem>>, vector<1x16x16xf32>,
    %c1 = arith.constant 1 : index
    %c0_10 = arith.constant 0 : index
    %c0_11 = arith.constant 0 : index
    %9 = vector.load %arg1[%c1, %c0_10, %c0_11] : memref<8x8x8xf32, #tpu.memory_space<vmem>>, vector<1x8x8xf32>
    %10 = vector.shape_cast %9 : vector<1x8x8xf32> to vector<8x8xf32>
    %cst_12 = arith.constant dense<0.000000e+00> : vector<16x8xf32>
    %11 = tpu.matmul %0, %10, %cst_12 {dimension_numbers = #tpu.dot_dimension_numbers<[1], [0], [0], [1], [0, 0, 1, 1], [], []>} : vector<16x8xf32>, vector<8x8xf32>, vector<16x8xf32> -> vector<16x8xf32>
    %cst_13 = arith.constant dense<0.000000e+00> : vector<16x16xf32>
    %12 = tpu.matmul %11, %1, %cst_13 {dimension_numbers = #tpu.dot_dimension_numbers<[1], [0], [0], [1], [0, 0, 1, 1], [], []>} : vector<16x8xf32>, vector<8x16xf32>, vector<16x16xf32> -> vector<16x16xf32>
    %c1_14 = arith.constant 1 : index
    %c0_15 = arith.constant 0 : index
    %c0_16 = arith.constant 0 : index
    %13 = vector.load %arg4[%c1_14, %c0_15, %c0_16] : memref<8x16x16xf32, #tpu.memory_space<vmem>>, vector<1x16x16xf32>
    %14 = vector.shape_cast %13 : vector<1x16x16xf32> to vector<16x16xf32>
    %15 = vector.shape_cast %12 : vector<16x16xf32> to vector<1x16x16xf32>
    tpu.vector_store %arg4[%c1_14, %c0_15, %c0_16], %15 {strides = array<i32>} : memref<8x16x16xf32, #tpu.memory_space<vmem>>, vector<1x16x16xf32>,
    %c2 = arith.constant 2 : index
    %c0_17 = arith.constant 0 : index
    %c0_18 = arith.constant 0 : index
    %16 = vector.load %arg1[%c2, %c0_17, %c0_18] : memref<8x8x8xf32, #tpu.memory_space<vmem>>, vector<1x8x8xf32>
    %17 = vector.shape_cast %16 : vector<1x8x8xf32> to vector<8x8xf32>
    %cst_19 = arith.constant dense<0.000000e+00> : vector<16x8xf32>
    %18 = tpu.matmul %0, %17, %cst_19 {dimension_numbers = #tpu.dot_dimension_numbers<[1], [0], [0], [1], [0, 0, 1, 1], [], []>} : vector<16x8xf32>, vector<8x8xf32>, vector<16x8xf32> -> vector<16x8xf32>
    %cst_20 = arith.constant dense<0.000000e+00> : vector<16x16xf32>
    %19 = tpu.matmul %18, %1, %cst_20 {dimension_numbers = #tpu.dot_dimension_numbers<[1], [0], [0], [1], [0, 0, 1, 1], [], []>} : vector<16x8xf32>, vector<8x16xf32>, vector<16x16xf32> -> vector<16x16xf32>
    %c2_21 = arith.constant 2 : index
    %c0_22 = arith.constant 0 : index
    %c0_23 = arith.constant 0 : index
    %20 = vector.load %arg4[%c2_21, %c0_22, %c0_23] : memref<8x16x16xf32, #tpu.memory_space<vmem>>, vector<1x16x16xf32>
    %21 = vector.shape_cast %20 : vector<1x16x16xf32> to vector<16x16xf32>
    %22 = vector.shape_cast %19 : vector<16x16xf32> to vector<1x16x16xf32>
    tpu.vector_store %arg4[%c2_21, %c0_22, %c0_23], %22 {strides = array<i32>} : memref<8x16x16xf32, #tpu.memory_space<vmem>>, vector<1x16x16xf32>,
    %c3 = arith.constant 3 : index
    %c0_24 = arith.constant 0 : index
    %c0_25 = arith.constant 0 : index
    %23 = vector.load %arg1[%c3, %c0_24, %c0_25] : memref<8x8x8xf32, #tpu.memory_space<vmem>>, vector<1x8x8xf32>
    %24 = vector.shape_cast %23 : vector<1x8x8xf32> to vector<8x8xf32>
    %cst_26 = arith.constant dense<0.000000e+00> : vector<16x8xf32>
    %25 = tpu.matmul %0, %24, %cst_26 {dimension_numbers = #tpu.dot_dimension_numbers<[1], [0], [0], [1], [0, 0, 1, 1], [], []>} : vector<16x8xf32>, vector<8x8xf32>, vector<16x8xf32> -> vector<16x8xf32>
    %cst_27 = arith.constant dense<0.000000e+00> : vector<16x16xf32>
    %26 = tpu.matmul %25, %1, %cst_27 {dimension_numbers = #tpu.dot_dimension_numbers<[1], [0], [0], [1], [0, 0, 1, 1], [], []>} : vector<16x8xf32>, vector<8x16xf32>, vector<16x16xf32> -> vector<16x16xf32>
    %c3_28 = arith.constant 3 : index
    %c0_29 = arith.constant 0 : index
    %c0_30 = arith.constant 0 : index
    %27 = vector.load %arg4[%c3_28, %c0_29, %c0_30] : memref<8x16x16xf32, #tpu.memory_space<vmem>>, vector<1x16x16xf32>
    %28 = vector.shape_cast %27 : vector<1x16x16xf32> to vector<16x16xf32>
    %29 = vector.shape_cast %26 : vector<16x16xf32> to vector<1x16x16xf32>
    tpu.vector_store %arg4[%c3_28, %c0_29, %c0_30], %29 {strides = array<i32>} : memref<8x16x16xf32, #tpu.memory_space<vmem>>, vector<1x16x16xf32>,
    %c4 = arith.constant 4 : index
    %c0_31 = arith.constant 0 : index
    %c0_32 = arith.constant 0 : index
    %30 = vector.load %arg1[%c4, %c0_31, %c0_32] : memref<8x8x8xf32, #tpu.memory_space<vmem>>, vector<1x8x8xf32>
    %31 = vector.shape_cast %30 : vector<1x8x8xf32> to vector<8x8xf32>
    %cst_33 = arith.constant dense<0.000000e+00> : vector<16x8xf32>
    %32 = tpu.matmul %0, %31, %cst_33 {dimension_numbers = #tpu.dot_dimension_numbers<[1], [0], [0], [1], [0, 0, 1, 1], [], []>} : vector<16x8xf32>, vector<8x8xf32>, vector<16x8xf32> -> vector<16x8xf32>
    %cst_34 = arith.constant dense<0.000000e+00> : vector<16x16xf32>
    %33 = tpu.matmul %32, %1, %cst_34 {dimension_numbers = #tpu.dot_dimension_numbers<[1], [0], [0], [1], [0, 0, 1, 1], [], []>} : vector<16x8xf32>, vector<8x16xf32>, vector<16x16xf32> -> vector<16x16xf32>
    %c4_35 = arith.constant 4 : index
    %c0_36 = arith.constant 0 : index
    %c0_37 = arith.constant 0 : index
    %34 = vector.load %arg4[%c4_35, %c0_36, %c0_37] : memref<8x16x16xf32, #tpu.memory_space<vmem>>, vector<1x16x16xf32>
    %35 = vector.shape_cast %34 : vector<1x16x16xf32> to vector<16x16xf32>
    %36 = vector.shape_cast %33 : vector<16x16xf32> to vector<1x16x16xf32>
    tpu.vector_store %arg4[%c4_35, %c0_36, %c0_37], %36 {strides = array<i32>} : memref<8x16x16xf32, #tpu.memory_space<vmem>>, vector<1x16x16xf32>,
    %c5 = arith.constant 5 : index
    %c0_38 = arith.constant 0 : index
    %c0_39 = arith.constant 0 : index
    %37 = vector.load %arg1[%c5, %c0_38, %c0_39] : memref<8x8x8xf32, #tpu.memory_space<vmem>>, vector<1x8x8xf32>
    %38 = vector.shape_cast %37 : vector<1x8x8xf32> to vector<8x8xf32>
    %cst_40 = arith.constant dense<0.000000e+00> : vector<16x8xf32>
    %39 = tpu.matmul %0, %38, %cst_40 {dimension_numbers = #tpu.dot_dimension_numbers<[1], [0], [0], [1], [0, 0, 1, 1], [], []>} : vector<16x8xf32>, vector<8x8xf32>, vector<16x8xf32> -> vector<16x8xf32>
    %cst_41 = arith.constant dense<0.000000e+00> : vector<16x16xf32>
    %40 = tpu.matmul %39, %1, %cst_41 {dimension_numbers = #tpu.dot_dimension_numbers<[1], [0], [0], [1], [0, 0, 1, 1], [], []>} : vector<16x8xf32>, vector<8x16xf32>, vector<16x16xf32> -> vector<16x16xf32>
    %c5_42 = arith.constant 5 : index
    %c0_43 = arith.constant 0 : index
    %c0_44 = arith.constant 0 : index
    %41 = vector.load %arg4[%c5_42, %c0_43, %c0_44] : memref<8x16x16xf32, #tpu.memory_space<vmem>>, vector<1x16x16xf32>
    %42 = vector.shape_cast %41 : vector<1x16x16xf32> to vector<16x16xf32>
    %43 = vector.shape_cast %40 : vector<16x16xf32> to vector<1x16x16xf32>
    tpu.vector_store %arg4[%c5_42, %c0_43, %c0_44], %43 {strides = array<i32>} : memref<8x16x16xf32, #tpu.memory_space<vmem>>, vector<1x16x16xf32>,
    %c6 = arith.constant 6 : index
    %c0_45 = arith.constant 0 : index
    %c0_46 = arith.constant 0 : index
    %44 = vector.load %arg1[%c6, %c0_45, %c0_46] : memref<8x8x8xf32, #tpu.memory_space<vmem>>, vector<1x8x8xf32>
    %45 = vector.shape_cast %44 : vector<1x8x8xf32> to vector<8x8xf32>
    %cst_47 = arith.constant dense<0.000000e+00> : vector<16x8xf32>
    %46 = tpu.matmul %0, %45, %cst_47 {dimension_numbers = #tpu.dot_dimension_numbers<[1], [0], [0], [1], [0, 0, 1, 1], [], []>} : vector<16x8xf32>, vector<8x8xf32>, vector<16x8xf32> -> vector<16x8xf32>
    %cst_48 = arith.constant dense<0.000000e+00> : vector<16x16xf32>
    %47 = tpu.matmul %46, %1, %cst_48 {dimension_numbers = #tpu.dot_dimension_numbers<[1], [0], [0], [1], [0, 0, 1, 1], [], []>} : vector<16x8xf32>, vector<8x16xf32>, vector<16x16xf32> -> vector<16x16xf32>
    %c6_49 = arith.constant 6 : index
    %c0_50 = arith.constant 0 : index
    %c0_51 = arith.constant 0 : index
    %48 = vector.load %arg4[%c6_49, %c0_50, %c0_51] : memref<8x16x16xf32, #tpu.memory_space<vmem>>, vector<1x16x16xf32>
    %49 = vector.shape_cast %48 : vector<1x16x16xf32> to vector<16x16xf32>
    %50 = vector.shape_cast %47 : vector<16x16xf32> to vector<1x16x16xf32>
    tpu.vector_store %arg4[%c6_49, %c0_50, %c0_51], %50 {strides = array<i32>} : memref<8x16x16xf32, #tpu.memory_space<vmem>>, vector<1x16x16xf32>,
    %c7 = arith.constant 7 : index
    %c0_52 = arith.constant 0 : index
    %c0_53 = arith.constant 0 : index
    %51 = vector.load %arg1[%c7, %c0_52, %c0_53] : memref<8x8x8xf32, #tpu.memory_space<vmem>>, vector<1x8x8xf32>
    %52 = vector.shape_cast %51 : vector<1x8x8xf32> to vector<8x8xf32>
    %cst_54 = arith.constant dense<0.000000e+00> : vector<16x8xf32>
    %53 = tpu.matmul %0, %52, %cst_54 {dimension_numbers = #tpu.dot_dimension_numbers<[1], [0], [0], [1], [0, 0, 1, 1], [], []>} : vector<16x8xf32>, vector<8x8xf32>, vector<16x8xf32> -> vector<16x8xf32>
    %cst_55 = arith.constant dense<0.000000e+00> : vector<16x16xf32>
    %54 = tpu.matmul %53, %1, %cst_55 {dimension_numbers = #tpu.dot_dimension_numbers<[1], [0], [0], [1], [0, 0, 1, 1], [], []>} : vector<16x8xf32>, vector<8x16xf32>, vector<16x16xf32> -> vector<16x16xf32>
    %c7_56 = arith.constant 7 : index
    %c0_57 = arith.constant 0 : index
    %c0_58 = arith.constant 0 : index
    %55 = vector.load %arg4[%c7_56, %c0_57, %c0_58] : memref<8x16x16xf32, #tpu.memory_space<vmem>>, vector<1x16x16xf32>
    %56 = vector.shape_cast %55 : vector<1x16x16xf32> to vector<16x16xf32>
    %57 = vector.shape_cast %54 : vector<16x16xf32> to vector<1x16x16xf32>
    tpu.vector_store %arg4[%c7_56, %c0_57, %c0_58], %57 {strides = array<i32>} : memref<8x16x16xf32, #tpu.memory_space<vmem>>, vector<1x16x16xf32>,
    return
  }
  func.func @transform_0(%arg0: i32) -> (i32, i32, i32) {
    %c0_i32 = arith.constant 0 : i32
    %c0_i32_0 = arith.constant 0 : i32
    %c0_i32_1 = arith.constant 0 : i32
    return %arg0, %c0_i32, %c0_i32_0 : i32, i32, i32
  }
  func.func @transform_1(%arg0: i32) -> (i32, i32) {
    %c0_i32 = arith.constant 0 : i32
    %c0_i32_0 = arith.constant 0 : i32
    %c0_i32_1 = arith.constant 0 : i32
    return %c0_i32, %c0_i32_0 : i32, i32
  }
  func.func @transform_2(%arg0: i32) -> (i32, i32) {
    %c0_i32 = arith.constant 0 : i32
    %c0_i32_0 = arith.constant 0 : i32
    %c0_i32_1 = arith.constant 0 : i32
    return %c0_i32, %c0_i32_0 : i32, i32
  }
  func.func @transform_3(%arg0: i32) -> (i32, i32, i32) {
    %c0_i32 = arith.constant 0 : i32
    %c0_i32_0 = arith.constant 0 : i32
    %c0_i32_1 = arith.constant 0 : i32
    return %arg0, %c0_i32, %c0_i32_0 : i32, i32, i32
  }
}

module attributes {stable_mosaic.version = 11 : i64} {
  func.func @_mm_bias_act_kernel(%arg0: i32, %arg1: i32, %arg2: i32, %arg3: memref<512x128xbf16, #tpu.memory_space<vmem>>, %arg4: memref<128x128xbf16, #tpu.memory_space<vmem>>, %arg5: memref<1x128xf32, #tpu.memory_space<vmem>>, %arg6: memref<512x128xf32, #tpu.memory_space<vmem>>, %arg7: memref<512x128xf32, #tpu.memory_space<vmem>>) attributes {dimension_semantics = [#tpu.dimension_semantics<parallel>, #tpu.dimension_semantics<parallel>, #tpu.dimension_semantics<arbitrary>], iteration_bounds = array<i64: 1, 1, 2>, scalar_prefetch = 0 : i64, scratch_operands = 1 : i64, tpu.core_type = #tpu.core_type<tc>, window_params = [{transform_indices = @transform_0, window_bounds = array<i64: 512, 128>}, {transform_indices = @transform_1, window_bounds = array<i64: 128, 128>}, {transform_indices = @transform_2, window_bounds = array<i64: 1, 128>}, {transform_indices = @transform_3, window_bounds = array<i64: 512, 128>}]} {
    %c0_i32 = arith.constant 0 : i32
    %0 = arith.cmpi eq, %arg2, %c0_i32 : i32
    %1 = arith.extui %0 : i1 to i32
    %c0_i32_0 = arith.constant 0 : i32
    %2 = arith.cmpi ne, %1, %c0_i32_0 : i32
    scf.if %2 {
      %cst_9 = arith.constant 0.000000e+00 : f32
      %12 = vector.broadcast %cst_9 : f32 to vector<512x128xf32>
      %c0_10 = arith.constant 0 : index
      %c0_11 = arith.constant 0 : index
      %13 = vector.load %arg7[%c0_10, %c0_11] : memref<512x128xf32, #tpu.memory_space<vmem>>, vector<512x128xf32>
      tpu.vector_store %arg7[%c0_10, %c0_11], %12 {strides = array<i32>} : memref<512x128xf32, #tpu.memory_space<vmem>>, vector<512x128xf32>,
    } else {
    }
    %c0 = arith.constant 0 : index
    %c0_1 = arith.constant 0 : index
    %3 = vector.load %arg7[%c0, %c0_1] : memref<512x128xf32, #tpu.memory_space<vmem>>, vector<512x128xf32>
    %c0_2 = arith.constant 0 : index
    %c0_3 = arith.constant 0 : index
    %4 = vector.load %arg3[%c0_2, %c0_3] : memref<512x128xbf16, #tpu.memory_space<vmem>>, vector<512x128xbf16>
    %c0_4 = arith.constant 0 : index
    %c0_5 = arith.constant 0 : index
    %5 = vector.load %arg4[%c0_4, %c0_5] : memref<128x128xbf16, #tpu.memory_space<vmem>>, vector<128x128xbf16>
    %cst = arith.constant dense<0.000000e+00> : vector<512x128xf32>
    %6 = tpu.matmul %4, %5, %cst {dimension_numbers = #tpu.dot_dimension_numbers<[1], [0], [0], [1], [0, 0, 1, 1], [], []>} : vector<512x128xbf16>, vector<128x128xbf16>, vector<512x128xf32> -> vector<512x128xf32>
    %7 = arith.addf %3, %6 : vector<512x128xf32>
    %c0_6 = arith.constant 0 : index
    %c0_7 = arith.constant 0 : index
    %8 = vector.load %arg7[%c0_6, %c0_7] : memref<512x128xf32, #tpu.memory_space<vmem>>, vector<512x128xf32>
    tpu.vector_store %arg7[%c0_6, %c0_7], %7 {strides = array<i32>} : memref<512x128xf32, #tpu.memory_space<vmem>>, vector<512x128xf32>,
    %c1_i32 = arith.constant 1 : i32
    %9 = arith.cmpi eq, %arg2, %c1_i32 : i32
    %10 = arith.extui %9 : i1 to i32
    %c0_i32_8 = arith.constant 0 : i32
    %11 = arith.cmpi ne, %10, %c0_i32_8 : i32
    scf.if %11 {
      %c0_9 = arith.constant 0 : index
      %c0_10 = arith.constant 0 : index
      %12 = vector.load %arg7[%c0_9, %c0_10] : memref<512x128xf32, #tpu.memory_space<vmem>>, vector<512x128xf32>
      %c0_11 = arith.constant 0 : index
      %c0_12 = arith.constant 0 : index
      %13 = vector.load %arg5[%c0_11, %c0_12] : memref<1x128xf32, #tpu.memory_space<vmem>>, vector<1x128xf32>
      %14 = vector.broadcast %13 : vector<1x128xf32> to vector<512x128xf32>
      %15 = arith.addf %12, %14 : vector<512x128xf32>
      %c0_13 = arith.constant 0 : index
      %c0_14 = arith.constant 0 : index
      %16 = vector.load %arg6[%c0_13, %c0_14] : memref<512x128xf32, #tpu.memory_space<vmem>>, vector<512x128xf32>
      tpu.vector_store %arg6[%c0_13, %c0_14], %15 {strides = array<i32>} : memref<512x128xf32, #tpu.memory_space<vmem>>, vector<512x128xf32>,
    } else {
    }
    return
  }
  func.func @transform_0(%arg0: i32, %arg1: i32, %arg2: i32) -> (i32, i32) {
    %c0_i32 = arith.constant 0 : i32
    return %arg0, %arg2 : i32, i32
  }
  func.func @transform_1(%arg0: i32, %arg1: i32, %arg2: i32) -> (i32, i32) {
    %c0_i32 = arith.constant 0 : i32
    return %arg2, %arg1 : i32, i32
  }
  func.func @transform_2(%arg0: i32, %arg1: i32, %arg2: i32) -> (i32, i32) {
    %c0_i32 = arith.constant 0 : i32
    %c0_i32_0 = arith.constant 0 : i32
    return %c0_i32, %arg1 : i32, i32
  }
  func.func @transform_3(%arg0: i32, %arg1: i32, %arg2: i32) -> (i32, i32) {
    %c0_i32 = arith.constant 0 : i32
    return %arg0, %arg1 : i32, i32
  }
}

</mosaic_0001>

<bundles_post_ra>
// kernel: _forward_impl.4
= control target key start
LH: loop header
LB: loop body
LE: loop exit
PB: predicated region body
PF: predicated region fallthrough
CT: control target
= control target key end

     0   :  { %s602_s1 = inlined_call_operand.vmem [shape: bf16[128,128], index: 1, kind: input, shape index: {}]   ;;  %s603_s0 = inlined_call_operand.vmem [shape: bf16[128,128], index: 0, kind: input, shape index: {}]   ;;  %s604_s2 = inlined_call_operand.vmem [shape: f32[1,128], index: 2, kind: input, shape index: {}]   ;;  %s605_s3 = inlined_call_operand.vmem [shape: f32[128,128], index: 3, kind: output, shape index: {}]  }
   0x1   :  { %v467_v0 = vld [vmem:[%s602_s1 + $0x38] sm:$0xff]   ;;  %v468_v1 = vld [vmem:[%s602_s1 + $0x30] sm:$0xff]   ;;  %v469_v2 = vld [vmem:[%s602_s1 + $0x28] sm:$0xff]  }
   0x2   :  { %419 = vmatprep.subr.bf16.mxu0 %v467_v0  ;;  %451 = vmatprep.subr.bf16.mxu1 %v467_v0  ;;  %v470_v3 = vld [vmem:[%s602_s1 + $0x20] sm:$0xff]   ;;  %v471_v6 = vld [vmem:[%s602_s1 + $0x18] sm:$0xff]   ;;  %v472_v7 = vld [vmem:[%s602_s1 + $0x10] sm:$0xff]  }
   0x3   :  { %420 = vmatpush3.bf16.msra.mxu0 %v467_v0  ;;  %459 = vmatpush3.bf16.msra.mxu1 %v467_v0  ;;  %v475_v4 = vld [vmem:[%s603_s0] sm:$0xff]   ;;  %v473_v8 = vld [vmem:[%s602_s1 + $0x8] sm:$0xff]   ;;  %v479_v12 = vld [vmem:[%s603_s0 + $0x10] sm:$0xff]  }
   0x4   :  { %421 = vmatprep.subr.bf16.mxu0 %v468_v1  ;;  %452 = vmatprep.subr.bf16.mxu1 %v468_v1  ;;  %v476_v5 = vld [vmem:[%s603_s0 + $0x20] sm:$0xff]   ;;  %v477_v10 = vld [vmem:[%s603_s0 + $0x8] sm:$0xff]   ;;  %v480_v13 = vld [vmem:[%s603_s0 + $0x30] sm:$0xff]  }
   0x5   :  { %435 = vmatprep.mubr.bf16.mxu0 %v475_v4  ;;  %443 = vmatprep.mubr.bf16.mxu1 %v476_v5  ;;  %v474_v9 = vld [vmem:[%s602_s1] sm:$0xff]   ;;  %v478_v11 = vld [vmem:[%s603_s0 + $0x28] sm:$0xff]   ;;  %v481_v14 = vld [vmem:[%s603_s0 + $0x18] sm:$0xff]  }
   0x6   :  { %v482_v15 = vld [vmem:[%s603_s0 + $0x38] sm:$0xff]   ;;  %v402_v16 = vld [vmem:[%s604_s2] ss:$0 sm:$0xff] }
   0x7   :  { %422 = vmatpush3.bf16.msra.mxu0 %v468_v1  ;;  %460 = vmatpush3.bf16.msra.mxu1 %v468_v1 }
   0x8   :  { %423 = vmatprep.subr.bf16.mxu0 %v469_v2  ;;  %453 = vmatprep.subr.bf16.mxu1 %v469_v2 }
   0xb   :  { %424 = vmatpush3.bf16.msra.mxu0 %v469_v2  ;;  %461 = vmatpush3.bf16.msra.mxu1 %v469_v2 }
   0xc   :  { %425 = vmatprep.subr.bf16.mxu0 %v470_v3  ;;  %454 = vmatprep.subr.bf16.mxu1 %v470_v3 }
   0xf   :  { %426 = vmatpush3.bf16.msra.mxu0 %v470_v3  ;;  %462 = vmatpush3.bf16.msra.mxu1 %v470_v3 }
  0x10   :  { %427 = vmatprep.subr.bf16.mxu0 %v471_v6  ;;  %455 = vmatprep.subr.bf16.mxu1 %v471_v6 }
  0x13   :  { %428 = vmatpush3.bf16.msra.mxu0 %v471_v6  ;;  %463 = vmatpush3.bf16.msra.mxu1 %v471_v6 }
  0x14   :  { %429 = vmatprep.subr.bf16.mxu0 %v472_v7  ;;  %456 = vmatprep.subr.bf16.mxu1 %v472_v7 }
  0x17   :  { %430 = vmatpush3.bf16.msra.mxu0 %v472_v7  ;;  %464 = vmatpush3.bf16.msra.mxu1 %v472_v7 }
  0x18   :  { %431 = vmatprep.subr.bf16.mxu0 %v473_v8  ;;  %457 = vmatprep.subr.bf16.mxu1 %v473_v8 }
  0x1b   :  { %432 = vmatpush3.bf16.msra.mxu0 %v473_v8  ;;  %465 = vmatpush3.bf16.msra.mxu1 %v473_v8 }
  0x1c   :  { %433 = vmatprep.subr.bf16.mxu0 %v474_v9  ;;  %458 = vmatprep.subr.bf16.mxu1 %v474_v9 }
  0x1f   :  { %434 = vmatpush3.bf16.msra.mxu0 %v474_v9  ;;  %466 = vmatpush3.bf16.msra.mxu1 %v474_v9 }
  0x22   :  { %436 = vmatmul.mubr.bf16.vlgmr.msra.gmra.mxu0 %v477_v10  ;;  %444 = vmatmul.mubr.bf16.vlgmr.msra.gmra.mxu1 %v478_v11 }
  0x23   :  { %439 = vmatprep.mubr.bf16.mxu0 %v479_v12  ;;  %447 = vmatprep.mubr.bf16.mxu1 %v480_v13 }
  0x2a   :  { %440 = vmatmul.mubr.bf16.gmra.mxu0 %v481_v14  ;;  %448 = vmatmul.mubr.bf16.gmra.mxu1 %v482_v15 }
  0xe2   :  { %v437_v17 = vpop.f32.mrf.mxu0  ;;  %v445_v18 = vpop.f32.mrf.mxu1 }
  0xe3   :  { %v336_v19 = vadd.f32 %v437_v17, %v402_v16  ;;  %v344_v20 = vadd.f32 %v445_v18, %v402_v16 }
  0xe4   :  { %v213_v21 = vpop.f32.mrf.mxu0  ;;  %v245_v22 = vpop.f32.mrf.mxu1 }
  0xe5   :  { %v352_v23 = vmax.f32 %v336_v19, 0.0  ;;  %v360_v24 = vmax.f32 %v344_v20, 0.0  ;;  %v334_v25 = vadd.f32 %v402_v16, %v213_v21  ;;  %v342_v26 = vadd.f32 %v402_v16, %v245_v22 }
  0xe6   :  { %v438_v27 = vpop.f32.mrf.mxu0  ;;  %v446_v28 = vpop.f32.mrf.mxu1 }
  0xe7   :  { %368 = vst [vmem:[%s605_s3 + $0x10] sm:$0xff] %v352_v23  ;;  %376 = vst [vmem:[%s605_s3 + $0x50] sm:$0xff] %v360_v24  ;;  %v350_v29 = vmax.f32 %v334_v25, 0.0  ;;  %v358_v30 = vmax.f32 %v342_v26, 0.0  ;;  %v337_v31 = vadd.f32 %v438_v27, %v402_v16  ;;  %v345_v32 = vadd.f32 %v446_v28, %v402_v16 }
  0xe8   :  { %v216_v33 = vpop.f32.mrf.mxu0  ;;  %v248_v34 = vpop.f32.mrf.mxu1 }
  0xe9   :  { %366 = vst [vmem:[%s605_s3] sm:$0xff] %v350_v29  ;;  %374 = vst [vmem:[%s605_s3 + $0x40] sm:$0xff] %v358_v30  ;;  %v353_v35 = vmax.f32 %v337_v31, 0.0  ;;  %v361_v36 = vmax.f32 %v345_v32, 0.0  ;;  %v335_v37 = vadd.f32 %v402_v16, %v216_v33  ;;  %v343_v38 = vadd.f32 %v402_v16, %v248_v34 }
  0xea   :  { %v441_v39 = vpop.f32.mrf.mxu0  ;;  %v449_v40 = vpop.f32.mrf.mxu1 }
  0xeb   :  { %369 = vst [vmem:[%s605_s3 + $0x18] sm:$0xff] %v353_v35  ;;  %377 = vst [vmem:[%s605_s3 + $0x58] sm:$0xff] %v361_v36  ;;  %v351_v41 = vmax.f32 %v335_v37, 0.0  ;;  %v359_v42 = vmax.f32 %v343_v38, 0.0  ;;  %v340_v43 = vadd.f32 %v441_v39, %v402_v16  ;;  %v348_v44 = vadd.f32 %v449_v40, %v402_v16 }
  0xec   :  { %v229_v45 = vpop.f32.mrf.mxu0  ;;  %v261_v46 = vpop.f32.mrf.mxu1 }
  0xed   :  { %367 = vst [vmem:[%s605_s3 + $0x8] sm:$0xff] %v351_v41  ;;  %375 = vst [vmem:[%s605_s3 + $0x48] sm:$0xff] %v359_v42  ;;  %v356_v47 = vmax.f32 %v340_v43, 0.0  ;;  %v364_v48 = vmax.f32 %v348_v44, 0.0  ;;  %v338_v49 = vadd.f32 %v402_v16, %v229_v45  ;;  %v346_v50 = vadd.f32 %v402_v16, %v261_v46 }
  0xee   :  { %v442_v51 = vpop.f32.mrf.mxu0  ;;  %v450_v52 = vpop.f32.mrf.mxu1 }
  0xef   :  { %372 = vst [vmem:[%s605_s3 + $0x30] sm:$0xff] %v356_v47  ;;  %380 = vst [vmem:[%s605_s3 + $0x70] sm:$0xff] %v364_v48  ;;  %v354_v53 = vmax.f32 %v338_v49, 0.0  ;;  %v362_v54 = vmax.f32 %v346_v50, 0.0  ;;  %v341_v55 = vadd.f32 %v442_v51, %v402_v16  ;;  %v349_v56 = vadd.f32 %v450_v52, %v402_v16 }
  0xf0   :  { %v232_v57 = vpop.f32.mrf.mxu0  ;;  %v264_v58 = vpop.f32.mrf.mxu1 }
  0xf1   :  { %370 = vst [vmem:[%s605_s3 + $0x20] sm:$0xff] %v354_v53  ;;  %378 = vst [vmem:[%s605_s3 + $0x60] sm:$0xff] %v362_v54  ;;  %v357_v59 = vmax.f32 %v341_v55, 0.0  ;;  %v365_v60 = vmax.f32 %v349_v56, 0.0  ;;  %v339_v61 = vadd.f32 %v402_v16, %v232_v57  ;;  %v347_v62 = vadd.f32 %v402_v16, %v264_v58 }
  0xf3   :  { %373 = vst [vmem:[%s605_s3 + $0x38] sm:$0xff] %v357_v59  ;;  %381 = vst [vmem:[%s605_s3 + $0x78] sm:$0xff] %v365_v60  ;;  %v355_v63 = vmax.f32 %v339_v61, 0.0  ;;  %v363_v0 = vmax.f32 %v347_v62, 0.0 }
  0xf5   :  { %371 = vst [vmem:[%s605_s3 + $0x28] sm:$0xff] %v355_v63  ;;  %379 = vst [vmem:[%s605_s3 + $0x68] sm:$0xff] %v363_v0 }

// kernel: _forward_impl.6
= control target key start
LH: loop header
LB: loop body
LE: loop exit
PB: predicated region body
PF: predicated region fallthrough
CT: control target
= control target key end

     0   :  { %s1761_s12 = smov 0   ;;  %s1867_s0 = inlined_call_operand.vmem [shape: f32[32,8,8], index: 0, kind: input, shape index: {}]   ;;  %s1868_s1 = inlined_call_operand.vmem [shape: f32[16,8], index: 1, kind: input, shape index: {}]   ;;  %s1869_s2 = inlined_call_operand.vmem [shape: f32[8,16], index: 2, kind: input, shape index: {}]   ;;  %s1870_s3 = inlined_call_operand.vmem [shape: f32[32,16,16], index: 3, kind: output, shape index: {}]  }
   0x1 LB: > { %s1531_s13 = sadd.s32 4294967295, %s1739_s12   ;;  %p1535_p0 = scmp.ge.s32.totalorder %s1739_s12, 1  ;;  %s1739_s12 = sphi %s1761_s12, %s13_s12  }
   0x2   : > { %p138_p1 = scmp.lt.s32.totalorder %s1739_s12, 5 }
   0x4   : > { %p139_p2 = pnand %p1535_p0, %p138_p1 }
   0x5   : > { %s1536_s14 = sshll.u32 (!%p139_p2), %s1531_s13, 3 }
   0x6   : > { %142 = sbr.rel (%p139_p2) target bundleno = 437 (0x1b5), region = 32  ;;  %p164_p3 = scmp.lt.s32.totalorder (!%p139_p2), %s1536_s14, 31 }
   0xb   : > { %v176_v0 = vld [vmem:[%s1868_s1] sm:$0xff]  ;;  %vm180_vm0 = vcmask 64512   ;;  %s1872_s14 = smov (!%p164_p3, %s1536_s14), 31  ;;  %v177_v2 = vld [vmem:[%s1868_s1 + $0x8] sm:$0xff]  ;;  %vm343_vm1 = vcmask 130048  }
   0xc   : > { %1647 = vmatprep.mubr.msk.f32.mxu0 %vm180_vm0, %v176_v0  ;;  %s1537_s17 = sshll.u32 %s1872_s14, 3  ;;  %v178_v10 = vld [vmem:[%s1869_s2] sm:$0xff]  ;;  %s1596_s25 = sshll.u32 %s1872_s14, 4 }
   0xd   : > { %s1779_s20 = scalar_lea.vmem %s1867_s0, %s1537_s17  ;;  %1650 = vmatprep.subr.mxu1 %v178_v10  ;;  %s1830_s28 = scalar_lea.vmem %s1870_s3, %s1596_s25 }
   0xe   : > { %v179_v1 = vld [vmem:[%s1779_s20] sm:$0xff]  ;;  %v1545_v3 = vld [vmem:[%s1779_s20 + $0x8] sm:$0xff]  ;;  %v1552_v4 = vld [vmem:[%s1779_s20 + $0x10] sm:$0xff]  ;;  %1651 = vmatpush3.msra.mxu1 %v178_v10 }
   0xf   : > { %1645 = vmatprep.subr.mxu0 %v179_v1  ;;  %v1559_v5 = vld [vmem:[%s1779_s20 + $0x18] sm:$0xff]  ;;  %v1566_v6 = vld [vmem:[%s1779_s20 + $0x20] sm:$0xff]  ;;  %v1573_v7 = vld [vmem:[%s1779_s20 + $0x28] sm:$0xff]  ;;  %1660 = vmatprep.subr.mxu1 %v178_v10 }
  0x10   : > { %1646 = vmatpush3.msra.mxu0 %v179_v1  ;;  %v1580_v8 = vld [vmem:[%s1779_s20 + $0x30] sm:$0xff]  ;;  %v1587_v9 = vld [vmem:[%s1779_s20 + $0x38] sm:$0xff] }
  0x11   : > { %1648 = vmatmul.mubr.msk.f32.vlgmr.msra.gmra.mxu0 %vm180_vm0, %v177_v2  ;;  %1655 = vmatprep.subr.mxu0 %v1545_v3 }
  0x12   : > { %1656 = vmatpush3.msra.mxu0 %v1545_v3  ;;  %1657 = vmatprep.mubr.msk.f32.mxu0 %vm180_vm0, %v176_v0 }
  0x13   : > { %1665 = vmatprep.subr.mxu0 %v1552_v4 }
  0x15   : > { %1658 = vmatmul.mubr.msk.f32.vlgmr.msra.gmra.mxu0 %vm180_vm0, %v177_v2 }
  0x16   : > { %1666 = vmatpush3.msra.mxu0 %v1552_v4  ;;  %1667 = vmatprep.mubr.msk.f32.mxu0 %vm180_vm0, %v176_v0 }
  0x17   : > { %1675 = vmatprep.subr.mxu0 %v1559_v5 }
  0x19   : > { %1668 = vmatmul.mubr.msk.f32.vlgmr.msra.gmra.mxu0 %vm180_vm0, %v177_v2 }
  0x1a   : > { %1676 = vmatpush3.msra.mxu0 %v1559_v5  ;;  %1677 = vmatprep.mubr.msk.f32.mxu0 %vm180_vm0, %v176_v0 }
  0x1b   : > { %1685 = vmatprep.subr.mxu0 %v1566_v6 }
  0x1d   : > { %1678 = vmatmul.mubr.msk.f32.vlgmr.msra.gmra.mxu0 %vm180_vm0, %v177_v2 }
  0x1e   : > { %1686 = vmatpush3.msra.mxu0 %v1566_v6  ;;  %1687 = vmatprep.mubr.msk.f32.mxu0 %vm180_vm0, %v176_v0 }
  0x1f   : > { %1695 = vmatprep.subr.mxu0 %v1573_v7 }
  0x21   : > { %1688 = vmatmul.mubr.msk.f32.vlgmr.msra.gmra.mxu0 %vm180_vm0, %v177_v2 }
  0x22   : > { %1696 = vmatpush3.msra.mxu0 %v1573_v7  ;;  %1697 = vmatprep.mubr.msk.f32.mxu0 %vm180_vm0, %v176_v0 }
  0x23   : > { %1705 = vmatprep.subr.mxu0 %v1580_v8 }
  0x25   : > { %1698 = vmatmul.mubr.msk.f32.vlgmr.msra.gmra.mxu0 %vm180_vm0, %v177_v2 }
  0x26   : > { %1706 = vmatpush3.msra.mxu0 %v1580_v8  ;;  %1707 = vmatprep.mubr.msk.f32.mxu0 %vm180_vm0, %v176_v0 }
  0x27   : > { %1715 = vmatprep.subr.mxu0 %v1587_v9 }
  0x29   : > { %1708 = vmatmul.mubr.msk.f32.vlgmr.msra.gmra.mxu0 %vm180_vm0, %v177_v2 }
  0x2a   : > { %1716 = vmatpush3.msra.mxu0 %v1587_v9  ;;  %1717 = vmatprep.mubr.msk.f32.mxu0 %vm180_vm0, %v176_v0 }
  0x2d   : > { %1718 = vmatmul.mubr.msk.f32.vlgmr.msra.gmra.mxu0 %vm180_vm0, %v177_v2 }
  0xd1   : > { %v1649_v11 = vpop.f32.mrf.mxu0 }
  0xd3   : > { %v253_v12 = vpop.f32.mrf.mxu0 }
  0xd4   : > { %1652 = vmatprep.mubr.msk.f32.mxu1 %vm180_vm0, %v253_v12 }
  0xd5   : > { %1653 = vmatmul.mubr.msk.f32.vlgmr.msra.gmra.mxu1 %vm180_vm0, %v1649_v11  ;;  %v1659_v13 = vpop.f32.mrf.mxu0 }
  0xd6   : > { %1661 = vmatpush3.msra.mxu1 %v178_v10 }
  0xd7   : > { %v414_v14 = vpop.f32.mrf.mxu0  ;;  %1670 = vmatprep.subr.mxu1 %v178_v10 }
  0xd8   : > { %1662 = vmatprep.mubr.msk.f32.mxu1 %vm180_vm0, %v414_v14 }
  0xd9   : > { %1663 = vmatmul.mubr.msk.f32.vlgmr.msra.gmra.mxu1 %vm180_vm0, %v1659_v13  ;;  %v1669_v15 = vpop.f32.mrf.mxu0 }
  0xda   : > { %1671 = vmatpush3.msra.mxu1 %v178_v10 }
  0xdb   : > { %v575_v16 = vpop.f32.mrf.mxu0  ;;  %1680 = vmatprep.subr.mxu1 %v178_v10 }
  0xdc   : > { %1672 = vmatprep.mubr.msk.f32.mxu1 %vm180_vm0, %v575_v16 }
  0xdd   : > { %1673 = vmatmul.mubr.msk.f32.vlgmr.msra.gmra.mxu1 %vm180_vm0, %v1669_v15  ;;  %v1679_v17 = vpop.f32.mrf.mxu0 }
  0xde   : > { %1681 = vmatpush3.msra.mxu1 %v178_v10 }
  0xdf   : > { %v736_v18 = vpop.f32.mrf.mxu0  ;;  %1690 = vmatprep.subr.mxu1 %v178_v10 }
  0xe0   : > { %1682 = vmatprep.mubr.msk.f32.mxu1 %vm180_vm0, %v736_v18 }
  0xe1   : > { %1683 = vmatmul.mubr.msk.f32.vlgmr.msra.gmra.mxu1 %vm180_vm0, %v1679_v17  ;;  %v1689_v19 = vpop.f32.mrf.mxu0 }
  0xe2   : > { %1691 = vmatpush3.msra.mxu1 %v178_v10 }
  0xe3   : > { %v897_v20 = vpop.f32.mrf.mxu0  ;;  %1700 = vmatprep.subr.mxu1 %v178_v10 }
  0xe4   : > { %1692 = vmatprep.mubr.msk.f32.mxu1 %vm180_vm0, %v897_v20 }
  0xe5   : > { %1693 = vmatmul.mubr.msk.f32.vlgmr.msra.gmra.mxu1 %vm180_vm0, %v1689_v19  ;;  %v1699_v21 = vpop.f32.mrf.mxu0 }
  0xe6   : > { %1701 = vmatpush3.msra.mxu1 %v178_v10 }
  0xe7   : > { %v1058_v22 = vpop.f32.mrf.mxu0  ;;  %1710 = vmatprep.subr.mxu1 %v178_v10 }
  0xe8   : > { %1702 = vmatprep.mubr.msk.f32.mxu1 %vm180_vm0, %v1058_v22 }
  0xe9   : > { %1703 = vmatmul.mubr.msk.f32.vlgmr.msra.gmra.mxu1 %vm180_vm0, %v1699_v21  ;;  %v1709_v23 = vpop.f32.mrf.mxu0 }
  0xea   : > { %1711 = vmatpush3.msra.mxu1 %v178_v10 }
  0xeb   : > { %v1219_v24 = vpop.f32.mrf.mxu0  ;;  %1720 = vmatprep.subr.mxu1 %v178_v10 }
  0xec   : > { %1712 = vmatprep.mubr.msk.f32.mxu1 %vm180_vm0, %v1219_v24 }
  0xed   : > { %1713 = vmatmul.mubr.msk.f32.vlgmr.msra.gmra.mxu1 %vm180_vm0, %v1709_v23  ;;  %v1719_v25 = vpop.f32.mrf.mxu0 }
  0xee   : > { %1721 = vmatpush3.msra.mxu1 %v178_v10 }
  0xef   : > { %v1380_v26 = vpop.f32.mrf.mxu0 }
  0xf0   : > { %1722 = vmatprep.mubr.msk.f32.mxu1 %vm180_vm0, %v1380_v26 }
  0xf1   : > { %1723 = vmatmul.mubr.msk.f32.vlgmr.msra.gmra.mxu1 %vm180_vm0, %v1719_v25 }
 0x195   : > { %v1654_v27 = vpop.f32.mrf.mxu1 }
 0x196   : > { %345 = vst.msk [vmem:[%s1830_s28 + $0x8] sm:$0xff] %vm343_vm1, %v1654_v27 }
 0x197   : > { %v334_v28 = vpop.f32.mrf.mxu1 }
 0x198   : > { %344 = vst.msk [vmem:[%s1830_s28] sm:$0xff] %vm343_vm1, %v334_v28 }
 0x199   : > { %v1664_v29 = vpop.f32.mrf.mxu1 }
 0x19a   : > { %1551 = vst.msk [vmem:[%s1830_s28 + $0x18] sm:$0xff] %vm343_vm1, %v1664_v29 }
 0x19b   : > { %v495_v30 = vpop.f32.mrf.mxu1 }
 0x19c   : > { %1550 = vst.msk [vmem:[%s1830_s28 + $0x10] sm:$0xff] %vm343_vm1, %v495_v30 }
 0x19d   : > { %v1674_v31 = vpop.f32.mrf.mxu1 }
 0x19e   : > { %1558 = vst.msk [vmem:[%s1830_s28 + $0x28] sm:$0xff] %vm343_vm1, %v1674_v31 }
 0x19f   : > { %v656_v32 = vpop.f32.mrf.mxu1 }
 0x1a0   : > { %1557 = vst.msk [vmem:[%s1830_s28 + $0x20] sm:$0xff] %vm343_vm1, %v656_v32 }
 0x1a1   : > { %v1684_v33 = vpop.f32.mrf.mxu1 }
 0x1a2   : > { %1565 = vst.msk [vmem:[%s1830_s28 + $0x38] sm:$0xff] %vm343_vm1, %v1684_v33 }
 0x1a3   : > { %v817_v34 = vpop.f32.mrf.mxu1 }
 0x1a4   : > { %1564 = vst.msk [vmem:[%s1830_s28 + $0x30] sm:$0xff] %vm343_vm1, %v817_v34 }
 0x1a5   : > { %v1694_v35 = vpop.f32.mrf.mxu1 }
 0x1a6   : > { %1572 = vst.msk [vmem:[%s1830_s28 + $0x48] sm:$0xff] %vm343_vm1, %v1694_v35 }
 0x1a7   : > { %v978_v36 = vpop.f32.mrf.mxu1 }
 0x1a8   : > { %1571 = vst.msk [vmem:[%s1830_s28 + $0x40] sm:$0xff] %vm343_vm1, %v978_v36 }
 0x1a9   : > { %v1704_v37 = vpop.f32.mrf.mxu1 }
 0x1aa   : > { %1579 = vst.msk [vmem:[%s1830_s28 + $0x58] sm:$0xff] %vm343_vm1, %v1704_v37 }
 0x1ab   : > { %v1139_v38 = vpop.f32.mrf.mxu1 }
 0x1ac   : > { %1578 = vst.msk [vmem:[%s1830_s28 + $0x50] sm:$0xff] %vm343_vm1, %v1139_v38 }
 0x1ad   : > { %v1714_v39 = vpop.f32.mrf.mxu1 }
 0x1ae   : > { %1586 = vst.msk [vmem:[%s1830_s28 + $0x68] sm:$0xff] %vm343_vm1, %v1714_v39 }
 0x1af   : > { %v1300_v40 = vpop.f32.mrf.mxu1 }
 0x1b0   : > { %1585 = vst.msk [vmem:[%s1830_s28 + $0x60] sm:$0xff] %vm343_vm1, %v1300_v40 }
 0x1b1   : > { %v1724_v41 = vpop.f32.mrf.mxu1 }
 0x1b2   : > { %1593 = vst.msk [vmem:[%s1830_s28 + $0x78] sm:$0xff] %vm343_vm1, %v1724_v41 }
 0x1b3   : > { %v1461_v42 = vpop.f32.mrf.mxu1 }
 0x1b4   : > { %1592 = vst.msk [vmem:[%s1830_s28 + $0x70] sm:$0xff] %vm343_vm1, %v1461_v42 }
 0x1b5 PF: > { %s13_s12 = sadd.s32 1, %s1739_s12  }
 0x1b6   : > { %p10_p4 = scmp.ge.s32.totalorder %s13_s12, 6  }
 0x1b8   :  { %12 = sbr.rel (!%p10_p4) target bundleno = 1 (0x1), region = 76 }

// kernel: _forward_impl.7
= control target key start
LH: loop header
LB: loop body
LE: loop exit
PB: predicated region body
PF: predicated region fallthrough
CT: control target
= control target key end

     0   :  { %s2065_s12 = smov 0   ;;  %s2067_s13 = smov 0   ;;  %s2633_s0 = inlined_call_operand.vmem [shape: bf16[512,256], index: 0, kind: input, shape index: {}]   ;;  %s2634_s1 = inlined_call_operand.vmem [shape: bf16[256,128], index: 1, kind: input, shape index: {}]   ;;  %s2635_s2 = inlined_call_operand.vmem [shape: f32[1,128], index: 2, kind: input, shape index: {}]   ;;  %s2636_s3 = inlined_call_operand.vmem [shape: f32[512,128], index: 3, kind: output, shape index: {}]  }
   0x1   :  { %s2069_s14 = smov 0   ;;  %s2071_s15 = smov 0  }
   0x2   :  { %s2073_s16 = smov 0  }
   0x3 LB: > { %s25_s17 = sadd.s32 1, %s2038_s15  ;;  %p48_p1 = scmp.ne.s32.totalorder %s2030_s13, %s2026_s12  ;;  %s2042_s16 = sphi %s2073_s16, %s13_s16   ;;  %s2038_s15 = sphi %s2071_s15, %s2640_s15   ;;  %s2034_s14 = sphi %s2069_s14, %s2639_s14   ;;  %s2030_s13 = sphi %s2067_s13, %s2638_s13   ;;  %s2026_s12 = sphi %s2065_s12, %s2637_s12  }
   0x4   : > { %p26_p0 = scmp.ge.s32.totalorder %s25_s17, 2  ;;  %p49_p2 = scmp.eq.s32.totalorder %s2042_s16, 0 }
   0x5   : > { %s41_s19 = sadd.s32 1, %s2030_s13  ;;  %p1733_p5 = scmp.ge.s32.totalorder %s2042_s16, 2 }
   0x6   : > { %s2642_s17 = smov (%p26_p0, %s25_s17), 0  ;;  %p50_p3 = por %p49_p2, %p48_p1 }
   0x7   : > { %s37_s18 = ssub.s32 %s2038_s15, %s2642_s17  ;;  %162 = sbr.rel (%p1733_p5) target bundleno = 58 (0x3a), region = 20 }
   0x8   : > { %p39_p4 = scmp.eq.s32.totalorder %s37_s18, 0 }
   0xa   : > { %s2100_s20 = scalar_select %p39_p4, %s2030_s13, %s41_s19  }
   0xc   : > { %165 = sbr.rel (!%p50_p3) target bundleno = 58 (0x3a), region = 24  ;;  %s167_s21 = sand.u32 (%p50_p3), 1, %s2030_s13  }
   0xd   : > { %s1735_s22 = sshll.u32 (%p50_p3), %s2038_s15, 2  ;;  %s1734_s23 = sshll.u32 (%p50_p3), %s167_s21, 8 }
   0xe   : > { %s2108_s26 = scalar_lea.vmem (%p50_p3), %s2633_s0, %s1735_s22  ;;  %s2112_s27 = scalar_lea.vmem (%p50_p3), [#allocation3], %s1734_s23 }
   0xf   : > { %v191_v0 = vld [vmem:[%s2108_s26] sm:$0xf] (%p50_p3)  ;;  %v193_v1 = vld [vmem:[%s2108_s26 + $0x8] sm:$0xf] (%p50_p3)  ;;  %v195_v2 = vld [vmem:[%s2108_s26 + $0x10] sm:$0xf] (%p50_p3) }
  0x10   : > { %192 = vst [vmem:[%s2112_s27] sm:$0xf] (%p50_p3), %v191_v0  ;;  %194 = vst [vmem:[%s2112_s27 + $0x4] sm:$0xf] (%p50_p3), %v193_v1  ;;  %v197_v3 = vld [vmem:[%s2108_s26 + $0x18] sm:$0xf] (%p50_p3) }
  0x11   : > { %v199_v4 = vld [vmem:[%s2108_s26 + $0x20] sm:$0xf]  ;;  %196 = vst [vmem:[%s2112_s27 + $0x8] sm:$0xf] %v195_v2  ;;  %198 = vst [vmem:[%s2112_s27 + $0xc] sm:$0xf] %v197_v3 }
  0x12   : > { %200 = vst [vmem:[%s2112_s27 + $0x10] sm:$0xf] %v199_v4  ;;  %v201_v5 = vld [vmem:[%s2108_s26 + $0x28] sm:$0xf]  ;;  %v203_v6 = vld [vmem:[%s2108_s26 + $0x30] sm:$0xf] }
  0x13   : > { %v205_v7 = vld [vmem:[%s2108_s26 + $0x38] sm:$0xf]  ;;  %202 = vst [vmem:[%s2112_s27 + $0x14] sm:$0xf] %v201_v5  ;;  %204 = vst [vmem:[%s2112_s27 + $0x18] sm:$0xf] %v203_v6 }
  0x14   : > { %206 = vst [vmem:[%s2112_s27 + $0x1c] sm:$0xf] %v205_v7  ;;  %v207_v8 = vld [vmem:[%s2108_s26 + $0x40] sm:$0xf]  ;;  %v209_v9 = vld [vmem:[%s2108_s26 + $0x48] sm:$0xf] }
  0x15   : > { %v211_v10 = vld [vmem:[%s2108_s26 + $0x50] sm:$0xf]  ;;  %208 = vst [vmem:[%s2112_s27 + $0x20] sm:$0xf] %v207_v8  ;;  %210 = vst [vmem:[%s2112_s27 + $0x24] sm:$0xf] %v209_v9 }
  0x16   : > { %212 = vst [vmem:[%s2112_s27 + $0x28] sm:$0xf] %v211_v10  ;;  %v213_v11 = vld [vmem:[%s2108_s26 + $0x58] sm:$0xf]  ;;  %v215_v12 = vld [vmem:[%s2108_s26 + $0x60] sm:$0xf] }
  0x17   : > { %v217_v13 = vld [vmem:[%s2108_s26 + $0x68] sm:$0xf]  ;;  %214 = vst [vmem:[%s2112_s27 + $0x2c] sm:$0xf] %v213_v11  ;;  %216 = vst [vmem:[%s2112_s27 + $0x30] sm:$0xf] %v215_v12 }
  0x18   : > { %218 = vst [vmem:[%s2112_s27 + $0x34] sm:$0xf] %v217_v13  ;;  %v219_v14 = vld [vmem:[%s2108_s26 + $0x70] sm:$0xf]  ;;  %v221_v15 = vld [vmem:[%s2108_s26 + $0x78] sm:$0xf] }
  0x19   : > { %v223_v16 = vld [vmem:[%s2108_s26 + $0x80] sm:$0xf]  ;;  %220 = vst [vmem:[%s2112_s27 + $0x38] sm:$0xf] %v219_v14  ;;  %222 = vst [vmem:[%s2112_s27 + $0x3c] sm:$0xf] %v221_v15 }
  0x1a   : > { %224 = vst [vmem:[%s2112_s27 + $0x40] sm:$0xf] %v223_v16  ;;  %v225_v17 = vld [vmem:[%s2108_s26 + $0x88] sm:$0xf]  ;;  %v227_v18 = vld [vmem:[%s2108_s26 + $0x90] sm:$0xf] }
  0x1b   : > { %v229_v19 = vld [vmem:[%s2108_s26 + $0x98] sm:$0xf]  ;;  %226 = vst [vmem:[%s2112_s27 + $0x44] sm:$0xf] %v225_v17  ;;  %228 = vst [vmem:[%s2112_s27 + $0x48] sm:$0xf] %v227_v18 }
  0x1c   : > { %230 = vst [vmem:[%s2112_s27 + $0x4c] sm:$0xf] %v229_v19  ;;  %v231_v20 = vld [vmem:[%s2108_s26 + $0xa0] sm:$0xf]  ;;  %v233_v21 = vld [vmem:[%s2108_s26 + $0xa8] sm:$0xf] }
  0x1d   : > { %v235_v22 = vld [vmem:[%s2108_s26 + $0xb0] sm:$0xf]  ;;  %232 = vst [vmem:[%s2112_s27 + $0x50] sm:$0xf] %v231_v20  ;;  %234 = vst [vmem:[%s2112_s27 + $0x54] sm:$0xf] %v233_v21 }
  0x1e   : > { %236 = vst [vmem:[%s2112_s27 + $0x58] sm:$0xf] %v235_v22  ;;  %v237_v23 = vld [vmem:[%s2108_s26 + $0xb8] sm:$0xf]  ;;  %v239_v24 = vld [vmem:[%s2108_s26 + $0xc0] sm:$0xf] }
  0x1f   : > { %v241_v25 = vld [vmem:[%s2108_s26 + $0xc8] sm:$0xf]  ;;  %238 = vst [vmem:[%s2112_s27 + $0x5c] sm:$0xf] %v237_v23  ;;  %240 = vst [vmem:[%s2112_s27 + $0x60] sm:$0xf] %v239_v24 }
  0x20   : > { %242 = vst [vmem:[%s2112_s27 + $0x64] sm:$0xf] %v241_v25  ;;  %v243_v26 = vld [vmem:[%s2108_s26 + $0xd0] sm:$0xf]  ;;  %v245_v27 = vld [vmem:[%s2108_s26 + $0xd8] sm:$0xf] }
  0x21   : > { %v247_v28 = vld [vmem:[%s2108_s26 + $0xe0] sm:$0xf]  ;;  %244 = vst [vmem:[%s2112_s27 + $0x68] sm:$0xf] %v243_v26  ;;  %246 = vst [vmem:[%s2112_s27 + $0x6c] sm:$0xf] %v245_v27 }
  0x22   : > { %248 = vst [vmem:[%s2112_s27 + $0x70] sm:$0xf] %v247_v28  ;;  %v249_v29 = vld [vmem:[%s2108_s26 + $0xe8] sm:$0xf]  ;;  %v251_v30 = vld [vmem:[%s2108_s26 + $0xf0] sm:$0xf] }
  0x23   : > { %v253_v31 = vld [vmem:[%s2108_s26 + $0xf8] sm:$0xf]  ;;  %250 = vst [vmem:[%s2112_s27 + $0x74] sm:$0xf] %v249_v29  ;;  %252 = vst [vmem:[%s2112_s27 + $0x78] sm:$0xf] %v251_v30 }
  0x24   : > { %254 = vst [vmem:[%s2112_s27 + $0x7c] sm:$0xf] %v253_v31  ;;  %v255_v32 = vld [vmem:[%s2108_s26 + $0x100] sm:$0xf]  ;;  %v257_v33 = vld [vmem:[%s2108_s26 + $0x108] sm:$0xf] }
  0x25   : > { %v259_v34 = vld [vmem:[%s2108_s26 + $0x110] sm:$0xf]  ;;  %256 = vst [vmem:[%s2112_s27 + $0x80] sm:$0xf] %v255_v32  ;;  %258 = vst [vmem:[%s2112_s27 + $0x84] sm:$0xf] %v257_v33 }
  0x26   : > { %260 = vst [vmem:[%s2112_s27 + $0x88] sm:$0xf] %v259_v34  ;;  %v261_v35 = vld [vmem:[%s2108_s26 + $0x118] sm:$0xf]  ;;  %v263_v36 = vld [vmem:[%s2108_s26 + $0x120] sm:$0xf] }
  0x27   : > { %v265_v37 = vld [vmem:[%s2108_s26 + $0x128] sm:$0xf]  ;;  %262 = vst [vmem:[%s2112_s27 + $0x8c] sm:$0xf] %v261_v35  ;;  %264 = vst [vmem:[%s2112_s27 + $0x90] sm:$0xf] %v263_v36 }
  0x28   : > { %266 = vst [vmem:[%s2112_s27 + $0x94] sm:$0xf] %v265_v37  ;;  %v267_v38 = vld [vmem:[%s2108_s26 + $0x130] sm:$0xf]  ;;  %v269_v39 = vld [vmem:[%s2108_s26 + $0x138] sm:$0xf] }
  0x29   : > { %v271_v40 = vld [vmem:[%s2108_s26 + $0x140] sm:$0xf]  ;;  %268 = vst [vmem:[%s2112_s27 + $0x98] sm:$0xf] %v267_v38  ;;  %270 = vst [vmem:[%s2112_s27 + $0x9c] sm:$0xf] %v269_v39 }
  0x2a   : > { %272 = vst [vmem:[%s2112_s27 + $0xa0] sm:$0xf] %v271_v40  ;;  %v273_v41 = vld [vmem:[%s2108_s26 + $0x148] sm:$0xf]  ;;  %v275_v42 = vld [vmem:[%s2108_s26 + $0x150] sm:$0xf] }
  0x2b   : > { %v277_v43 = vld [vmem:[%s2108_s26 + $0x158] sm:$0xf]  ;;  %274 = vst [vmem:[%s2112_s27 + $0xa4] sm:$0xf] %v273_v41  ;;  %276 = vst [vmem:[%s2112_s27 + $0xa8] sm:$0xf] %v275_v42 }
  0x2c   : > { %278 = vst [vmem:[%s2112_s27 + $0xac] sm:$0xf] %v277_v43  ;;  %v279_v44 = vld [vmem:[%s2108_s26 + $0x160] sm:$0xf]  ;;  %v281_v45 = vld [vmem:[%s2108_s26 + $0x168] sm:$0xf] }
  0x2d   : > { %v283_v46 = vld [vmem:[%s2108_s26 + $0x170] sm:$0xf]  ;;  %280 = vst [vmem:[%s2112_s27 + $0xb0] sm:$0xf] %v279_v44  ;;  %282 = vst [vmem:[%s2112_s27 + $0xb4] sm:$0xf] %v281_v45 }
  0x2e   : > { %284 = vst [vmem:[%s2112_s27 + $0xb8] sm:$0xf] %v283_v46  ;;  %v285_v47 = vld [vmem:[%s2108_s26 + $0x178] sm:$0xf]  ;;  %v287_v48 = vld [vmem:[%s2108_s26 + $0x180] sm:$0xf] }
  0x2f   : > { %v289_v49 = vld [vmem:[%s2108_s26 + $0x188] sm:$0xf]  ;;  %286 = vst [vmem:[%s2112_s27 + $0xbc] sm:$0xf] %v285_v47  ;;  %288 = vst [vmem:[%s2112_s27 + $0xc0] sm:$0xf] %v287_v48 }
  0x30   : > { %290 = vst [vmem:[%s2112_s27 + $0xc4] sm:$0xf] %v289_v49  ;;  %v291_v50 = vld [vmem:[%s2108_s26 + $0x190] sm:$0xf]  ;;  %v293_v51 = vld [vmem:[%s2108_s26 + $0x198] sm:$0xf] }
  0x31   : > { %v295_v52 = vld [vmem:[%s2108_s26 + $0x1a0] sm:$0xf]  ;;  %292 = vst [vmem:[%s2112_s27 + $0xc8] sm:$0xf] %v291_v50  ;;  %294 = vst [vmem:[%s2112_s27 + $0xcc] sm:$0xf] %v293_v51 }
  0x32   : > { %296 = vst [vmem:[%s2112_s27 + $0xd0] sm:$0xf] %v295_v52  ;;  %v297_v53 = vld [vmem:[%s2108_s26 + $0x1a8] sm:$0xf]  ;;  %v299_v54 = vld [vmem:[%s2108_s26 + $0x1b0] sm:$0xf] }
  0x33   : > { %v301_v55 = vld [vmem:[%s2108_s26 + $0x1b8] sm:$0xf]  ;;  %298 = vst [vmem:[%s2112_s27 + $0xd4] sm:$0xf] %v297_v53  ;;  %300 = vst [vmem:[%s2112_s27 + $0xd8] sm:$0xf] %v299_v54 }
  0x34   : > { %302 = vst [vmem:[%s2112_s27 + $0xdc] sm:$0xf] %v301_v55  ;;  %v303_v56 = vld [vmem:[%s2108_s26 + $0x1c0] sm:$0xf]  ;;  %v305_v57 = vld [vmem:[%s2108_s26 + $0x1c8] sm:$0xf] }
  0x35   : > { %v307_v58 = vld [vmem:[%s2108_s26 + $0x1d0] sm:$0xf]  ;;  %304 = vst [vmem:[%s2112_s27 + $0xe0] sm:$0xf] %v303_v56  ;;  %306 = vst [vmem:[%s2112_s27 + $0xe4] sm:$0xf] %v305_v57 }
  0x36   : > { %308 = vst [vmem:[%s2112_s27 + $0xe8] sm:$0xf] %v307_v58  ;;  %v309_v59 = vld [vmem:[%s2108_s26 + $0x1d8] sm:$0xf]  ;;  %v311_v60 = vld [vmem:[%s2108_s26 + $0x1e0] sm:$0xf] }
  0x37   : > { %v313_v61 = vld [vmem:[%s2108_s26 + $0x1e8] sm:$0xf]  ;;  %310 = vst [vmem:[%s2112_s27 + $0xec] sm:$0xf] %v309_v59  ;;  %312 = vst [vmem:[%s2112_s27 + $0xf0] sm:$0xf] %v311_v60 }
  0x38   : > { %314 = vst [vmem:[%s2112_s27 + $0xf4] sm:$0xf] %v313_v61  ;;  %v315_v62 = vld [vmem:[%s2108_s26 + $0x1f0] sm:$0xf]  ;;  %v317_v63 = vld [vmem:[%s2108_s26 + $0x1f8] sm:$0xf] }
  0x39   : > { %316 = vst [vmem:[%s2112_s27 + $0xf8] sm:$0xf] %v315_v62  ;;  %318 = vst [vmem:[%s2112_s27 + $0xfc] sm:$0xf] %v317_v63 }
  0x3a PF: > { %p1736_p6 = scmp.ge.s32.totalorder %s2042_s16, 1  ;;  %p481_p7 = scmp.lt.s32.totalorder %s2042_s16, 3 }
  0x3c   : > { %p482_p8 = pnand %p1736_p6, %p481_p7 }
  0x3d   : > { %s488_s28 = sand.u32 (!%p482_p8), 1, %s2026_s12   ;;  %s1738_s29 = sshll.u32 (!%p482_p8), %s2034_s14, 4 }
  0x3e   : > { %485 = sbr.rel (%p482_p8) target bundleno = 431 (0x1af), region = 69  ;;  %s1737_s30 = sshll.u32 (!%p482_p8), %s488_s28, 8 }
  0x3f   : > { %p527_p9 = scmp.lt.s32.totalorder (!%p482_p8), %s1738_s29, 31  ;;  %s2249_s8 = scalar_lea.vmem (!%p482_p8), [#allocation3], %s1737_s30 }
  0x40   : > { %p1740_p10 = scmp.ne.s32.totalorder (!%p482_p8), %s2034_s14, 0 }
  0x43   : > { %s2644_s29 = smov (!%p527_p9, %s1738_s29), 31  ;;  %551 = sbr.rel (%p1740_p10) target bundleno = 105 (0x69), region = 77 }
  0x44   : > { %s1739_s4 = sshll.u32 %s2644_s29, 2 }
  0x45   : > { %s2247_s7 = scalar_lea.vmem %s2634_s1, %s1739_s4 }
  0x48   : > { %v2044_v0 = vmov 0.0  }
  0x49   : > { %552 = vst [vmem:[#allocation2 + $0xb0] sm:$0xff] %v2044_v0  ;;  %553 = vst [vmem:[#allocation2 + $0x1b0] sm:$0xff] %v2044_v0 }
  0x4a   : > { %554 = vst [vmem:[#allocation2 + $0xd8] sm:$0xff] %v2044_v0  ;;  %555 = vst [vmem:[#allocation2 + $0x18] sm:$0xff] %v2044_v0 }
  0x4b   : > { %556 = vst [vmem:[#allocation2 + $0x50] sm:$0xff] %v2044_v0  ;;  %557 = vst [vmem:[#allocation2 + $0x168] sm:$0xff] %v2044_v0 }
  0x4c   : > { %558 = vst [vmem:[#allocation2 + $0x130] sm:$0xff] %v2044_v0  ;;  %559 = vst [vmem:[#allocation2 + $0x48] sm:$0xff] %v2044_v0 }
  0x4d   : > { %560 = vst [vmem:[#allocation2 + $0x180] sm:$0xff] %v2044_v0  ;;  %561 = vst [vmem:[#allocation2 + $0x110] sm:$0xff] %v2044_v0 }
  0x4e   : > { %562 = vst [vmem:[#allocation2 + $0x118] sm:$0xff] %v2044_v0  ;;  %563 = vst [vmem:[#allocation2 + $0x98] sm:$0xff] %v2044_v0 }
  0x4f   : > { %564 = vst [vmem:[#allocation2 + $0x120] sm:$0xff] %v2044_v0  ;;  %565 = vst [vmem:[#allocation2 + $0x150] sm:$0xff] %v2044_v0 }
  0x50   : > { %566 = vst [vmem:[#allocation2 + $0x108] sm:$0xff] %v2044_v0  ;;  %567 = vst [vmem:[#allocation2 + $0x60] sm:$0xff] %v2044_v0 }
  0x51   : > { %568 = vst [vmem:[#allocation2 + $0xe0] sm:$0xff] %v2044_v0  ;;  %569 = vst [vmem:[#allocation2 + $0x188] sm:$0xff] %v2044_v0 }
  0x52   : > { %570 = vst [vmem:[#allocation2 + $0x138] sm:$0xff] %v2044_v0  ;;  %571 = vst [vmem:[#allocation2 + $0x140] sm:$0xff] %v2044_v0 }
  0x53   : > { %572 = vst [vmem:[#allocation2 + $0x80] sm:$0xff] %v2044_v0  ;;  %573 = vst [vmem:[#allocation2 + $0x1a8] sm:$0xff] %v2044_v0 }
  0x54   : > { %574 = vst [vmem:[#allocation2 + $0x1b8] sm:$0xff] %v2044_v0  ;;  %575 = vst [vmem:[#allocation2 + $0x28] sm:$0xff] %v2044_v0 }
  0x55   : > { %576 = vst [vmem:[#allocation2 + $0x1e8] sm:$0xff] %v2044_v0  ;;  %577 = vst [vmem:[#allocation2 + $0xf8] sm:$0xff] %v2044_v0 }
  0x56   : > { %578 = vst [vmem:[#allocation2 + $0x160] sm:$0xff] %v2044_v0  ;;  %579 = vst [vmem:[#allocation2 + $0x30] sm:$0xff] %v2044_v0 }
  0x57   : > { %580 = vst [vmem:[#allocation2 + $0x1e0] sm:$0xff] %v2044_v0  ;;  %581 = vst [vmem:[#allocation2] sm:$0xff] %v2044_v0 }
  0x58   : > { %582 = vst [vmem:[#allocation2 + $0xf0] sm:$0xff] %v2044_v0  ;;  %583 = vst [vmem:[#allocation2 + $0x8] sm:$0xff] %v2044_v0 }
  0x59   : > { %584 = vst [vmem:[#allocation2 + $0x148] sm:$0xff] %v2044_v0  ;;  %585 = vst [vmem:[#allocation2 + $0x1d0] sm:$0xff] %v2044_v0 }
  0x5a   : > { %586 = vst [vmem:[#allocation2 + $0x100] sm:$0xff] %v2044_v0  ;;  %587 = vst [vmem:[#allocation2 + $0xc8] sm:$0xff] %v2044_v0 }
  0x5b   : > { %588 = vst [vmem:[#allocation2 + $0x40] sm:$0xff] %v2044_v0  ;;  %589 = vst [vmem:[#allocation2 + $0x1f8] sm:$0xff] %v2044_v0 }
  0x5c   : > { %590 = vst [vmem:[#allocation2 + $0x20] sm:$0xff] %v2044_v0  ;;  %591 = vst [vmem:[#allocation2 + $0x128] sm:$0xff] %v2044_v0 }
  0x5d   : > { %592 = vst [vmem:[#allocation2 + $0x1a0] sm:$0xff] %v2044_v0  ;;  %593 = vst [vmem:[#allocation2 + $0x1f0] sm:$0xff] %v2044_v0 }
  0x5e   : > { %594 = vst [vmem:[#allocation2 + $0xe8] sm:$0xff] %v2044_v0  ;;  %595 = vst [vmem:[#allocation2 + $0x78] sm:$0xff] %v2044_v0 }
  0x5f   : > { %596 = vst [vmem:[#allocation2 + $0x70] sm:$0xff] %v2044_v0  ;;  %597 = vst [vmem:[#allocation2 + $0x90] sm:$0xff] %v2044_v0 }
  0x60   : > { %598 = vst [vmem:[#allocation2 + $0x1d8] sm:$0xff] %v2044_v0  ;;  %599 = vst [vmem:[#allocation2 + $0xd0] sm:$0xff] %v2044_v0 }
  0x61   : > { %600 = vst [vmem:[#allocation2 + $0xb8] sm:$0xff] %v2044_v0  ;;  %601 = vst [vmem:[#allocation2 + $0x88] sm:$0xff] %v2044_v0 }
  0x62   : > { %602 = vst [vmem:[#allocation2 + $0xa8] sm:$0xff] %v2044_v0  ;;  %603 = vst [vmem:[#allocation2 + $0x1c8] sm:$0xff] %v2044_v0 }
  0x63   : > { %604 = vst [vmem:[#allocation2 + $0x170] sm:$0xff] %v2044_v0  ;;  %605 = vst [vmem:[#allocation2 + $0x178] sm:$0xff] %v2044_v0 }
  0x64   : > { %606 = vst [vmem:[#allocation2 + $0x68] sm:$0xff] %v2044_v0  ;;  %607 = vst [vmem:[#allocation2 + $0x190] sm:$0xff] %v2044_v0 }
  0x65   : > { %608 = vst [vmem:[#allocation2 + $0x198] sm:$0xff] %v2044_v0  ;;  %609 = vst [vmem:[#allocation2 + $0x38] sm:$0xff] %v2044_v0 }
  0x66   : > { %610 = vst [vmem:[#allocation2 + $0xc0] sm:$0xff] %v2044_v0  ;;  %611 = vst [vmem:[#allocation2 + $0x1c0] sm:$0xff] %v2044_v0 }
  0x67   : > { %612 = vst [vmem:[#allocation2 + $0x158] sm:$0xff] %v2044_v0  ;;  %613 = vst [vmem:[#allocation2 + $0x10] sm:$0xff] %v2044_v0 }
  0x68   : > { %614 = vst [vmem:[#allocation2 + $0x58] sm:$0xff] %v2044_v0  ;;  %615 = vst [vmem:[#allocation2 + $0xa0] sm:$0xff] %v2044_v0 }
  0x69 PF: > { %v1964_v1 = vld [vmem:[%s2247_s7 + $0x38] sm:$0xff]   ;;  %v1965_v2 = vld [vmem:[%s2247_s7 + $0x30] sm:$0xff]   ;;  %v1966_v3 = vld [vmem:[%s2247_s7 + $0x28] sm:$0xff]   ;;  %p1781_p11 = scmp.ne.s32.totalorder %s2034_s14, 1 }
  0x6a   : > { %1827 = vmatprep.subr.bf16.mxu0 %v1964_v1  ;;  %1907 = vmatprep.subr.bf16.mxu1 %v1964_v1  ;;  %v1967_v4 = vld [vmem:[%s2247_s7 + $0x20] sm:$0xff]   ;;  %v1968_v7 = vld [vmem:[%s2247_s7 + $0x18] sm:$0xff]   ;;  %v1969_v8 = vld [vmem:[%s2247_s7 + $0x10] sm:$0xff]  }
  0x6b   : > { %1828 = vmatpush3.bf16.msra.mxu0 %v1964_v1  ;;  %1915 = vmatpush3.bf16.msra.mxu1 %v1964_v1  ;;  %v1972_v5 = vld [vmem:[%s2249_s8] sm:$0xff]   ;;  %v1970_v9 = vld [vmem:[%s2247_s7 + $0x8] sm:$0xff]   ;;  %v1976_v13 = vld [vmem:[%s2249_s8 + $0x10] sm:$0xff]  }
  0x6c   : > { %1829 = vmatprep.subr.bf16.mxu0 %v1965_v2  ;;  %1908 = vmatprep.subr.bf16.mxu1 %v1965_v2  ;;  %v1973_v6 = vld [vmem:[%s2249_s8 + $0x80] sm:$0xff]   ;;  %v1974_v11 = vld [vmem:[%s2249_s8 + $0x8] sm:$0xff]   ;;  %v1977_v14 = vld [vmem:[%s2249_s8 + $0x90] sm:$0xff]  }
  0x6d   : > { %1843 = vmatprep.mubr.bf16.mxu0 %v1972_v5  ;;  %1875 = vmatprep.mubr.bf16.mxu1 %v1973_v6  ;;  %v1971_v10 = vld [vmem:[%s2247_s7] sm:$0xff]   ;;  %v1975_v12 = vld [vmem:[%s2249_s8 + $0x88] sm:$0xff]   ;;  %v1978_v15 = vld [vmem:[%s2249_s8 + $0x18] sm:$0xff]  }
  0x6e   : > { %v1979_v16 = vld [vmem:[%s2249_s8 + $0x98] sm:$0xff]   ;;  %v1980_v17 = vld [vmem:[%s2249_s8 + $0x20] sm:$0xff]   ;;  %v1982_v19 = vld [vmem:[%s2249_s8 + $0x28] sm:$0xff]  }
  0x6f   : > { %1830 = vmatpush3.bf16.msra.mxu0 %v1965_v2  ;;  %1916 = vmatpush3.bf16.msra.mxu1 %v1965_v2  ;;  %v1981_v18 = vld [vmem:[%s2249_s8 + $0xa0] sm:$0xff]   ;;  %v1983_v20 = vld [vmem:[%s2249_s8 + $0xa8] sm:$0xff]   ;;  %v1984_v21 = vld [vmem:[%s2249_s8 + $0x30] sm:$0xff]  }
  0x70   : > { %1831 = vmatprep.subr.bf16.mxu0 %v1966_v3  ;;  %1909 = vmatprep.subr.bf16.mxu1 %v1966_v3  ;;  %v1985_v22 = vld [vmem:[%s2249_s8 + $0xb0] sm:$0xff]   ;;  %v1986_v23 = vld [vmem:[%s2249_s8 + $0x38] sm:$0xff]   ;;  %v1988_v25 = vld [vmem:[%s2249_s8 + $0x40] sm:$0xff]  }
  0x71   : > { %v1987_v24 = vld [vmem:[%s2249_s8 + $0xb8] sm:$0xff]   ;;  %v1989_v26 = vld [vmem:[%s2249_s8 + $0xc0] sm:$0xff]   ;;  %v1990_v27 = vld [vmem:[%s2249_s8 + $0x48] sm:$0xff]  }
  0x72   : > { %v1991_v28 = vld [vmem:[%s2249_s8 + $0xc8] sm:$0xff]   ;;  %v1992_v29 = vld [vmem:[%s2249_s8 + $0x50] sm:$0xff]   ;;  %v1994_v31 = vld [vmem:[%s2249_s8 + $0x58] sm:$0xff]  }
  0x73   : > { %1832 = vmatpush3.bf16.msra.mxu0 %v1966_v3  ;;  %1917 = vmatpush3.bf16.msra.mxu1 %v1966_v3  ;;  %v1993_v30 = vld [vmem:[%s2249_s8 + $0xd0] sm:$0xff]   ;;  %v1995_v32 = vld [vmem:[%s2249_s8 + $0xd8] sm:$0xff]   ;;  %v1996_v33 = vld [vmem:[%s2249_s8 + $0x60] sm:$0xff]  }
  0x74   : > { %1833 = vmatprep.subr.bf16.mxu0 %v1967_v4  ;;  %1910 = vmatprep.subr.bf16.mxu1 %v1967_v4  ;;  %v1997_v34 = vld [vmem:[%s2249_s8 + $0xe0] sm:$0xff]   ;;  %v1998_v35 = vld [vmem:[%s2249_s8 + $0x68] sm:$0xff]   ;;  %v2000_v37 = vld [vmem:[%s2249_s8 + $0x70] sm:$0xff]  }
  0x75   : > { %v1999_v36 = vld [vmem:[%s2249_s8 + $0xe8] sm:$0xff]   ;;  %v2001_v38 = vld [vmem:[%s2249_s8 + $0xf0] sm:$0xff]   ;;  %v2002_v39 = vld [vmem:[%s2249_s8 + $0x78] sm:$0xff]  }
  0x76   : > { %v2003_v40 = vld [vmem:[%s2249_s8 + $0xf8] sm:$0xff]   ;;  %v650_v42 = vld [vmem:[#allocation2 + $0x100] sm:$0xff]  ;;  %v616_v45 = vld [vmem:[#allocation2 + $0xb0] sm:$0xff] }
  0x77   : > { %1834 = vmatpush3.bf16.msra.mxu0 %v1967_v4  ;;  %1918 = vmatpush3.bf16.msra.mxu1 %v1967_v4  ;;  %v618_v41 = vld [vmem:[#allocation2 + $0xd8] sm:$0xff]  ;;  %v648_v46 = vld [vmem:[#allocation2 + $0x148] sm:$0xff]  ;;  %v617_v57 = vld [vmem:[#allocation2 + $0x1b0] sm:$0xff] }
  0x78   : > { %1835 = vmatprep.subr.bf16.mxu0 %v1968_v7  ;;  %1911 = vmatprep.subr.bf16.mxu1 %v1968_v7  ;;  %v619_v51 = vld [vmem:[#allocation2 + $0x18] sm:$0xff]  ;;  %v651_v52 = vld [vmem:[#allocation2 + $0xc8] sm:$0xff]  ;;  %v649_v58 = vld [vmem:[#allocation2 + $0x1d0] sm:$0xff] }
  0x79   : > { %v622_v63 = vld [vmem:[#allocation2 + $0x130] sm:$0xff]  ;;  %v654_v0 = vld [vmem:[#allocation2 + $0x20] sm:$0xff] }
  0x7a   : > { %v620_v5 = vld [vmem:[#allocation2 + $0x50] sm:$0xff]  ;;  %v652_v6 = vld [vmem:[#allocation2 + $0x40] sm:$0xff] }
  0x7b   : > { %1836 = vmatpush3.bf16.msra.mxu0 %v1968_v7  ;;  %1919 = vmatpush3.bf16.msra.mxu1 %v1968_v7 }
  0x7c   : > { %1837 = vmatprep.subr.bf16.mxu0 %v1969_v8  ;;  %1912 = vmatprep.subr.bf16.mxu1 %v1969_v8 }
  0x7f   : > { %1838 = vmatpush3.bf16.msra.mxu0 %v1969_v8  ;;  %1920 = vmatpush3.bf16.msra.mxu1 %v1969_v8 }
  0x80   : > { %1839 = vmatprep.subr.bf16.mxu0 %v1970_v9  ;;  %1913 = vmatprep.subr.bf16.mxu1 %v1970_v9 }
  0x83   : > { %1840 = vmatpush3.bf16.msra.mxu0 %v1970_v9  ;;  %1921 = vmatpush3.bf16.msra.mxu1 %v1970_v9 }
  0x84   : > { %1841 = vmatprep.subr.bf16.mxu0 %v1971_v10  ;;  %1914 = vmatprep.subr.bf16.mxu1 %v1971_v10 }
  0x87   : > { %1842 = vmatpush3.bf16.msra.mxu0 %v1971_v10  ;;  %1922 = vmatpush3.bf16.msra.mxu1 %v1971_v10 }
  0x8a   : > { %1844 = vmatmul.mubr.bf16.vlgmr.msra.gmra.mxu0 %v1974_v11  ;;  %1876 = vmatmul.mubr.bf16.vlgmr.msra.gmra.mxu1 %v1975_v12  ;;  %v623_v11 = vld [vmem:[#allocation2 + $0x48] sm:$0xff] }
  0x8b   : > { %1847 = vmatprep.mubr.bf16.mxu0 %v1976_v13  ;;  %1879 = vmatprep.mubr.bf16.mxu1 %v1977_v14  ;;  %v655_v12 = vld [vmem:[#allocation2 + $0x128] sm:$0xff] }
  0x92   : > { %1848 = vmatmul.mubr.bf16.gmra.mxu0 %v1978_v15  ;;  %1880 = vmatmul.mubr.bf16.gmra.mxu1 %v1979_v16 }
  0x93   : > { %1851 = vmatprep.mubr.bf16.mxu0 %v1980_v17  ;;  %1883 = vmatprep.mubr.bf16.mxu1 %v1981_v18  ;;  %v621_v17 = vld [vmem:[#allocation2 + $0x168] sm:$0xff]  ;;  %v653_v18 = vld [vmem:[#allocation2 + $0x1f8] sm:$0xff] }
  0x9a   : > { %1852 = vmatmul.mubr.bf16.gmra.mxu0 %v1982_v19  ;;  %1884 = vmatmul.mubr.bf16.gmra.mxu1 %v1983_v20 }
  0x9b   : > { %1855 = vmatprep.mubr.bf16.mxu0 %v1984_v21  ;;  %1887 = vmatprep.mubr.bf16.mxu1 %v1985_v22 }
  0xa2   : > { %1856 = vmatmul.mubr.bf16.gmra.mxu0 %v1986_v23  ;;  %1888 = vmatmul.mubr.bf16.gmra.mxu1 %v1987_v24  ;;  %v626_v23 = vld [vmem:[#allocation2 + $0x118] sm:$0xff]  ;;  %v658_v24 = vld [vmem:[#allocation2 + $0xe8] sm:$0xff] }
  0xa3   : > { %1859 = vmatprep.mubr.bf16.mxu0 %v1988_v25  ;;  %1891 = vmatprep.mubr.bf16.mxu1 %v1989_v26 }
  0xaa   : > { %1860 = vmatmul.mubr.bf16.gmra.mxu0 %v1990_v27  ;;  %1892 = vmatmul.mubr.bf16.gmra.mxu1 %v1991_v28 }
  0xab   : > { %1863 = vmatprep.mubr.bf16.mxu0 %v1992_v29  ;;  %1895 = vmatprep.mubr.bf16.mxu1 %v1993_v30  ;;  %v624_v29 = vld [vmem:[#allocation2 + $0x180] sm:$0xff] }
  0xac   : > { %v656_v30 = vld [vmem:[#allocation2 + $0x1a0] sm:$0xff] }
  0xb2   : > { %1864 = vmatmul.mubr.bf16.gmra.mxu0 %v1994_v31  ;;  %1896 = vmatmul.mubr.bf16.gmra.mxu1 %v1995_v32 }
  0xb3   : > { %1867 = vmatprep.mubr.bf16.mxu0 %v1996_v33  ;;  %1899 = vmatprep.mubr.bf16.mxu1 %v1997_v34 }
  0xba   : > { %1868 = vmatmul.mubr.bf16.gmra.mxu0 %v1998_v35  ;;  %1900 = vmatmul.mubr.bf16.gmra.mxu1 %v1999_v36  ;;  %v627_v35 = vld [vmem:[#allocation2 + $0x98] sm:$0xff] }
  0xbb   : > { %1871 = vmatprep.mubr.bf16.mxu0 %v2000_v37  ;;  %1903 = vmatprep.mubr.bf16.mxu1 %v2001_v38  ;;  %v659_v36 = vld [vmem:[#allocation2 + $0x78] sm:$0xff] }
  0xc2   : > { %1872 = vmatmul.mubr.bf16.gmra.mxu0 %v2002_v39  ;;  %1904 = vmatmul.mubr.bf16.gmra.mxu1 %v2003_v40 }
 0x14a   : > { %v1845_v43 = vpop.f32.mrf.mxu0  ;;  %v1877_v44 = vpop.f32.mrf.mxu1 }
 0x14b   : > { %v1291_v47 = vadd.f32 %v1845_v43, %v618_v41  ;;  %v1323_v48 = vadd.f32 %v1877_v44, %v650_v42  ;;  %v625_v41 = vld [vmem:[#allocation2 + $0x110] sm:$0xff] }
 0x14c   : > { %v1034_v49 = vpop.f32.mrf.mxu0  ;;  %v1162_v50 = vpop.f32.mrf.mxu1  ;;  %v657_v42 = vld [vmem:[#allocation2 + $0x1f0] sm:$0xff] }
 0x14d   : > { %1355 = vst [vmem:[#allocation2 + $0xd8] sm:$0xff] %v1291_v47  ;;  %1387 = vst [vmem:[#allocation2 + $0x100] sm:$0xff] %v1323_v48  ;;  %v1289_v53 = vadd.f32 %v1034_v49, %v616_v45  ;;  %v1321_v54 = vadd.f32 %v1162_v50, %v648_v46  ;;  %v630_v47 = vld [vmem:[#allocation2 + $0x108] sm:$0xff]  ;;  %v662_v48 = vld [vmem:[#allocation2 + $0x1d8] sm:$0xff] }
 0x14e   : > { %v1846_v55 = vpop.f32.mrf.mxu0  ;;  %v1878_v56 = vpop.f32.mrf.mxu1 }
 0x14f   : > { %1353 = vst [vmem:[#allocation2 + $0xb0] sm:$0xff] %v1289_v53  ;;  %1385 = vst [vmem:[#allocation2 + $0x148] sm:$0xff] %v1321_v54  ;;  %v1292_v59 = vadd.f32 %v1846_v55, %v619_v51  ;;  %v1324_v60 = vadd.f32 %v1878_v56, %v651_v52  ;;  %v628_v53 = vld [vmem:[#allocation2 + $0x120] sm:$0xff]  ;;  %v660_v54 = vld [vmem:[#allocation2 + $0x70] sm:$0xff] }
 0x150   : > { %v1037_v61 = vpop.f32.mrf.mxu0  ;;  %v1165_v62 = vpop.f32.mrf.mxu1 }
 0x151   : > { %1356 = vst [vmem:[#allocation2 + $0x18] sm:$0xff] %v1292_v59  ;;  %1388 = vst [vmem:[#allocation2 + $0xc8] sm:$0xff] %v1324_v60  ;;  %v1290_v1 = vadd.f32 %v1037_v61, %v617_v57  ;;  %v1322_v2 = vadd.f32 %v1165_v62, %v649_v58  ;;  %v631_v59 = vld [vmem:[#allocation2 + $0x60] sm:$0xff]  ;;  %v663_v60 = vld [vmem:[#allocation2 + $0xd0] sm:$0xff] }
 0x152   : > { %v1849_v3 = vpop.f32.mrf.mxu0  ;;  %v1881_v4 = vpop.f32.mrf.mxu1 }
 0x153   : > { %1354 = vst [vmem:[#allocation2 + $0x1b0] sm:$0xff] %v1290_v1  ;;  %1386 = vst [vmem:[#allocation2 + $0x1d0] sm:$0xff] %v1322_v2  ;;  %v1295_v7 = vadd.f32 %v1849_v3, %v622_v63  ;;  %v1327_v8 = vadd.f32 %v1881_v4, %v654_v0  ;;  %v629_v1 = vld [vmem:[#allocation2 + $0x150] sm:$0xff] }
 0x154   : > { %v1050_v9 = vpop.f32.mrf.mxu0  ;;  %v1178_v10 = vpop.f32.mrf.mxu1  ;;  %v661_v2 = vld [vmem:[#allocation2 + $0x90] sm:$0xff] }
 0x155   : > { %1359 = vst [vmem:[#allocation2 + $0x130] sm:$0xff] %v1295_v7  ;;  %1391 = vst [vmem:[#allocation2 + $0x20] sm:$0xff] %v1327_v8  ;;  %v1293_v13 = vadd.f32 %v1050_v9, %v620_v5  ;;  %v1325_v14 = vadd.f32 %v1178_v10, %v652_v6  ;;  %v634_v7 = vld [vmem:[#allocation2 + $0x138] sm:$0xff]  ;;  %v666_v8 = vld [vmem:[#allocation2 + $0xa8] sm:$0xff] }
 0x156   : > { %v1850_v15 = vpop.f32.mrf.mxu0  ;;  %v1882_v16 = vpop.f32.mrf.mxu1 }
 0x157   : > { %1357 = vst [vmem:[#allocation2 + $0x50] sm:$0xff] %v1293_v13  ;;  %1389 = vst [vmem:[#allocation2 + $0x40] sm:$0xff] %v1325_v14  ;;  %v1296_v19 = vadd.f32 %v1850_v15, %v623_v11  ;;  %v1328_v20 = vadd.f32 %v1882_v16, %v655_v12  ;;  %v632_v13 = vld [vmem:[#allocation2 + $0xe0] sm:$0xff]  ;;  %v664_v14 = vld [vmem:[#allocation2 + $0xb8] sm:$0xff] }
 0x158   : > { %v1053_v21 = vpop.f32.mrf.mxu0  ;;  %v1181_v22 = vpop.f32.mrf.mxu1 }
 0x159   : > { %1360 = vst [vmem:[#allocation2 + $0x48] sm:$0xff] %v1296_v19  ;;  %1392 = vst [vmem:[#allocation2 + $0x128] sm:$0xff] %v1328_v20  ;;  %v1294_v25 = vadd.f32 %v1053_v21, %v621_v17  ;;  %v1326_v26 = vadd.f32 %v1181_v22, %v653_v18  ;;  %v635_v19 = vld [vmem:[#allocation2 + $0x140] sm:$0xff]  ;;  %v667_v20 = vld [vmem:[#allocation2 + $0x1c8] sm:$0xff] }
 0x15a   : > { %v1853_v27 = vpop.f32.mrf.mxu0  ;;  %v1885_v28 = vpop.f32.mrf.mxu1 }
 0x15b   : > { %1358 = vst [vmem:[#allocation2 + $0x168] sm:$0xff] %v1294_v25  ;;  %1390 = vst [vmem:[#allocation2 + $0x1f8] sm:$0xff] %v1326_v26  ;;  %v1299_v31 = vadd.f32 %v1853_v27, %v626_v23  ;;  %v1331_v32 = vadd.f32 %v1885_v28, %v658_v24  ;;  %v633_v25 = vld [vmem:[#allocation2 + $0x188] sm:$0xff] }
 0x15c   : > { %v1066_v33 = vpop.f32.mrf.mxu0  ;;  %v1194_v34 = vpop.f32.mrf.mxu1  ;;  %v665_v26 = vld [vmem:[#allocation2 + $0x88] sm:$0xff] }
 0x15d   : > { %1363 = vst [vmem:[#allocation2 + $0x118] sm:$0xff] %v1299_v31  ;;  %1395 = vst [vmem:[#allocation2 + $0xe8] sm:$0xff] %v1331_v32  ;;  %v1297_v37 = vadd.f32 %v1066_v33, %v624_v29  ;;  %v1329_v38 = vadd.f32 %v1194_v34, %v656_v30  ;;  %v638_v31 = vld [vmem:[#allocation2 + $0x1b8] sm:$0xff]  ;;  %v670_v32 = vld [vmem:[#allocation2 + $0x68] sm:$0xff] }
 0x15e   : > { %v1854_v39 = vpop.f32.mrf.mxu0  ;;  %v1886_v40 = vpop.f32.mrf.mxu1 }
 0x15f   : > { %1361 = vst [vmem:[#allocation2 + $0x180] sm:$0xff] %v1297_v37  ;;  %1393 = vst [vmem:[#allocation2 + $0x1a0] sm:$0xff] %v1329_v38  ;;  %v1300_v43 = vadd.f32 %v1854_v39, %v627_v35  ;;  %v1332_v44 = vadd.f32 %v1886_v40, %v659_v36  ;;  %v636_v37 = vld [vmem:[#allocation2 + $0x80] sm:$0xff]  ;;  %v668_v38 = vld [vmem:[#allocation2 + $0x170] sm:$0xff] }
 0x160   : > { %v1069_v45 = vpop.f32.mrf.mxu0  ;;  %v1197_v46 = vpop.f32.mrf.mxu1 }
 0x161   : > { %1364 = vst [vmem:[#allocation2 + $0x98] sm:$0xff] %v1300_v43  ;;  %1396 = vst [vmem:[#allocation2 + $0x78] sm:$0xff] %v1332_v44  ;;  %v1298_v49 = vadd.f32 %v1069_v45, %v625_v41  ;;  %v1330_v50 = vadd.f32 %v1197_v46, %v657_v42  ;;  %v639_v43 = vld [vmem:[#allocation2 + $0x28] sm:$0xff]  ;;  %v671_v44 = vld [vmem:[#allocation2 + $0x190] sm:$0xff] }
 0x162   : > { %v1857_v51 = vpop.f32.mrf.mxu0  ;;  %v1889_v52 = vpop.f32.mrf.mxu1 }
 0x163   : > { %1362 = vst [vmem:[#allocation2 + $0x110] sm:$0xff] %v1298_v49  ;;  %1394 = vst [vmem:[#allocation2 + $0x1f0] sm:$0xff] %v1330_v50  ;;  %v1303_v55 = vadd.f32 %v1857_v51, %v630_v47  ;;  %v1335_v56 = vadd.f32 %v1889_v52, %v662_v48  ;;  %v637_v49 = vld [vmem:[#allocation2 + $0x1a8] sm:$0xff]  ;;  %v669_v50 = vld [vmem:[#allocation2 + $0x178] sm:$0xff] }
 0x164   : > { %v1082_v57 = vpop.f32.mrf.mxu0  ;;  %v1210_v58 = vpop.f32.mrf.mxu1 }
 0x165   : > { %1367 = vst [vmem:[#allocation2 + $0x108] sm:$0xff] %v1303_v55  ;;  %1399 = vst [vmem:[#allocation2 + $0x1d8] sm:$0xff] %v1335_v56  ;;  %v1301_v61 = vadd.f32 %v1082_v57, %v628_v53  ;;  %v1333_v62 = vadd.f32 %v1210_v58, %v660_v54  ;;  %v642_v55 = vld [vmem:[#allocation2 + $0x160] sm:$0xff] }
 0x166   : > { %v1858_v63 = vpop.f32.mrf.mxu0  ;;  %v1890_v0 = vpop.f32.mrf.mxu1  ;;  %v674_v56 = vld [vmem:[#allocation2 + $0xc0] sm:$0xff] }
 0x167   : > { %1365 = vst [vmem:[#allocation2 + $0x120] sm:$0xff] %v1301_v61  ;;  %1397 = vst [vmem:[#allocation2 + $0x70] sm:$0xff] %v1333_v62  ;;  %v1304_v3 = vadd.f32 %v1858_v63, %v631_v59  ;;  %v1336_v4 = vadd.f32 %v1890_v0, %v663_v60  ;;  %v640_v61 = vld [vmem:[#allocation2 + $0x1e8] sm:$0xff]  ;;  %v672_v62 = vld [vmem:[#allocation2 + $0x198] sm:$0xff] }
 0x168   : > { %v1085_v5 = vpop.f32.mrf.mxu0  ;;  %v1213_v6 = vpop.f32.mrf.mxu1 }
 0x169   : > { %1368 = vst [vmem:[#allocation2 + $0x60] sm:$0xff] %v1304_v3  ;;  %1400 = vst [vmem:[#allocation2 + $0xd0] sm:$0xff] %v1336_v4  ;;  %v1302_v9 = vadd.f32 %v1085_v5, %v629_v1  ;;  %v1334_v10 = vadd.f32 %v1213_v6, %v661_v2  ;;  %v643_v3 = vld [vmem:[#allocation2 + $0x30] sm:$0xff]  ;;  %v675_v4 = vld [vmem:[#allocation2 + $0x1c0] sm:$0xff] }
 0x16a   : > { %v1861_v11 = vpop.f32.mrf.mxu0  ;;  %v1893_v12 = vpop.f32.mrf.mxu1 }
 0x16b   : > { %1366 = vst [vmem:[#allocation2 + $0x150] sm:$0xff] %v1302_v9  ;;  %1398 = vst [vmem:[#allocation2 + $0x90] sm:$0xff] %v1334_v10  ;;  %v1307_v15 = vadd.f32 %v1861_v11, %v634_v7  ;;  %v1339_v16 = vadd.f32 %v1893_v12, %v666_v8  ;;  %v641_v9 = vld [vmem:[#allocation2 + $0xf8] sm:$0xff] }
 0x16c   : > { %v1098_v17 = vpop.f32.mrf.mxu0  ;;  %v1226_v18 = vpop.f32.mrf.mxu1  ;;  %v673_v10 = vld [vmem:[#allocation2 + $0x38] sm:$0xff] }
 0x16d   : > { %1371 = vst [vmem:[#allocation2 + $0x138] sm:$0xff] %v1307_v15  ;;  %1403 = vst [vmem:[#allocation2 + $0xa8] sm:$0xff] %v1339_v16  ;;  %v1305_v21 = vadd.f32 %v1098_v17, %v632_v13  ;;  %v1337_v22 = vadd.f32 %v1226_v18, %v664_v14  ;;  %v646_v15 = vld [vmem:[#allocation2 + $0xf0] sm:$0xff]  ;;  %v678_v16 = vld [vmem:[#allocation2 + $0x58] sm:$0xff] }
 0x16e   : > { %v1862_v23 = vpop.f32.mrf.mxu0  ;;  %v1894_v24 = vpop.f32.mrf.mxu1 }
 0x16f   : > { %1369 = vst [vmem:[#allocation2 + $0xe0] sm:$0xff] %v1305_v21  ;;  %1401 = vst [vmem:[#allocation2 + $0xb8] sm:$0xff] %v1337_v22  ;;  %v1308_v27 = vadd.f32 %v1862_v23, %v635_v19  ;;  %v1340_v28 = vadd.f32 %v1894_v24, %v667_v20  ;;  %v644_v21 = vld [vmem:[#allocation2 + $0x1e0] sm:$0xff]  ;;  %v676_v22 = vld [vmem:[#allocation2 + $0x158] sm:$0xff] }
 0x170   : > { %v1101_v29 = vpop.f32.mrf.mxu0  ;;  %v1229_v30 = vpop.f32.mrf.mxu1 }
 0x171   : > { %1372 = vst [vmem:[#allocation2 + $0x140] sm:$0xff] %v1308_v27  ;;  %1404 = vst [vmem:[#allocation2 + $0x1c8] sm:$0xff] %v1340_v28  ;;  %v1306_v33 = vadd.f32 %v1101_v29, %v633_v25  ;;  %v1338_v34 = vadd.f32 %v1229_v30, %v665_v26  ;;  %v647_v27 = vld [vmem:[#allocation2 + $0x8] sm:$0xff]  ;;  %v679_v28 = vld [vmem:[#allocation2 + $0xa0] sm:$0xff] }
 0x172   : > { %v1865_v35 = vpop.f32.mrf.mxu0  ;;  %v1897_v36 = vpop.f32.mrf.mxu1 }
 0x173   : > { %1370 = vst [vmem:[#allocation2 + $0x188] sm:$0xff] %v1306_v33  ;;  %1402 = vst [vmem:[#allocation2 + $0x88] sm:$0xff] %v1338_v34  ;;  %v1311_v39 = vadd.f32 %v1865_v35, %v638_v31  ;;  %v1343_v40 = vadd.f32 %v1897_v36, %v670_v32  ;;  %v645_v33 = vld [vmem:[#allocation2] sm:$0xff]  ;;  %v677_v34 = vld [vmem:[#allocation2 + $0x10] sm:$0xff] }
 0x174   : > { %v1114_v41 = vpop.f32.mrf.mxu0  ;;  %v1242_v42 = vpop.f32.mrf.mxu1 }
 0x175   : > { %1375 = vst [vmem:[#allocation2 + $0x1b8] sm:$0xff] %v1311_v39  ;;  %1407 = vst [vmem:[#allocation2 + $0x68] sm:$0xff] %v1343_v40  ;;  %v1309_v45 = vadd.f32 %v1114_v41, %v636_v37  ;;  %v1341_v46 = vadd.f32 %v1242_v42, %v668_v38 }
 0x176   : > { %v1866_v47 = vpop.f32.mrf.mxu0  ;;  %v1898_v48 = vpop.f32.mrf.mxu1 }
 0x177   : > { %1373 = vst [vmem:[#allocation2 + $0x80] sm:$0xff] %v1309_v45  ;;  %1405 = vst [vmem:[#allocation2 + $0x170] sm:$0xff] %v1341_v46  ;;  %v1312_v51 = vadd.f32 %v1866_v47, %v639_v43  ;;  %v1344_v52 = vadd.f32 %v1898_v48, %v671_v44 }
 0x178   : > { %v1117_v53 = vpop.f32.mrf.mxu0  ;;  %v1245_v54 = vpop.f32.mrf.mxu1 }
 0x179   : > { %1376 = vst [vmem:[#allocation2 + $0x28] sm:$0xff] %v1312_v51  ;;  %1408 = vst [vmem:[#allocation2 + $0x190] sm:$0xff] %v1344_v52  ;;  %v1310_v57 = vadd.f32 %v1117_v53, %v637_v49  ;;  %v1342_v58 = vadd.f32 %v1245_v54, %v669_v50 }
 0x17a   : > { %v1869_v59 = vpop.f32.mrf.mxu0  ;;  %v1901_v60 = vpop.f32.mrf.mxu1 }
 0x17b   : > { %1374 = vst [vmem:[#allocation2 + $0x1a8] sm:$0xff] %v1310_v57  ;;  %1406 = vst [vmem:[#allocation2 + $0x178] sm:$0xff] %v1342_v58  ;;  %v1315_v63 = vadd.f32 %v1869_v59, %v642_v55  ;;  %v1347_v0 = vadd.f32 %v1901_v60, %v674_v56 }
 0x17c   : > { %v1130_v1 = vpop.f32.mrf.mxu0  ;;  %v1258_v2 = vpop.f32.mrf.mxu1 }
 0x17d   : > { %1379 = vst [vmem:[#allocation2 + $0x160] sm:$0xff] %v1315_v63  ;;  %1411 = vst [vmem:[#allocation2 + $0xc0] sm:$0xff] %v1347_v0  ;;  %v1313_v5 = vadd.f32 %v1130_v1, %v640_v61  ;;  %v1345_v6 = vadd.f32 %v1258_v2, %v672_v62 }
 0x17e   : > { %v1870_v7 = vpop.f32.mrf.mxu0  ;;  %v1902_v8 = vpop.f32.mrf.mxu1 }
 0x17f   : > { %1377 = vst [vmem:[#allocation2 + $0x1e8] sm:$0xff] %v1313_v5  ;;  %1409 = vst [vmem:[#allocation2 + $0x198] sm:$0xff] %v1345_v6  ;;  %v1316_v11 = vadd.f32 %v1870_v7, %v643_v3  ;;  %v1348_v12 = vadd.f32 %v1902_v8, %v675_v4 }
 0x180   : > { %v1133_v13 = vpop.f32.mrf.mxu0  ;;  %v1261_v14 = vpop.f32.mrf.mxu1 }
 0x181   : > { %1380 = vst [vmem:[#allocation2 + $0x30] sm:$0xff] %v1316_v11  ;;  %1412 = vst [vmem:[#allocation2 + $0x1c0] sm:$0xff] %v1348_v12  ;;  %v1314_v17 = vadd.f32 %v1133_v13, %v641_v9  ;;  %v1346_v18 = vadd.f32 %v1261_v14, %v673_v10 }
 0x182   : > { %v1873_v19 = vpop.f32.mrf.mxu0  ;;  %v1905_v20 = vpop.f32.mrf.mxu1 }
 0x183   : > { %1378 = vst [vmem:[#allocation2 + $0xf8] sm:$0xff] %v1314_v17  ;;  %1410 = vst [vmem:[#allocation2 + $0x38] sm:$0xff] %v1346_v18  ;;  %v1319_v23 = vadd.f32 %v1873_v19, %v646_v15  ;;  %v1351_v24 = vadd.f32 %v1905_v20, %v678_v16 }
 0x184   : > { %v1146_v25 = vpop.f32.mrf.mxu0  ;;  %v1274_v26 = vpop.f32.mrf.mxu1 }
 0x185   : > { %1383 = vst [vmem:[#allocation2 + $0xf0] sm:$0xff] %v1319_v23  ;;  %1415 = vst [vmem:[#allocation2 + $0x58] sm:$0xff] %v1351_v24  ;;  %v1317_v29 = vadd.f32 %v1146_v25, %v644_v21  ;;  %v1349_v30 = vadd.f32 %v1274_v26, %v676_v22 }
 0x186   : > { %v1874_v31 = vpop.f32.mrf.mxu0  ;;  %v1906_v32 = vpop.f32.mrf.mxu1 }
 0x187   : > { %1381 = vst [vmem:[#allocation2 + $0x1e0] sm:$0xff] %v1317_v29  ;;  %1413 = vst [vmem:[#allocation2 + $0x158] sm:$0xff] %v1349_v30  ;;  %v1320_v35 = vadd.f32 %v1874_v31, %v647_v27  ;;  %v1352_v36 = vadd.f32 %v1906_v32, %v679_v28  ;;  %1420 = sbr.rel (%p1781_p11) target bundleno = 431 (0x1af), region = 81 }
 0x188   : > { %v1149_v37 = vpop.f32.mrf.mxu0  ;;  %v1277_v38 = vpop.f32.mrf.mxu1 }
 0x189   : > { %1384 = vst [vmem:[#allocation2 + $0x8] sm:$0xff] %v1320_v35  ;;  %1416 = vst [vmem:[#allocation2 + $0xa0] sm:$0xff] %v1352_v36  ;;  %v1318_v39 = vadd.f32 %v1149_v37, %v645_v33  ;;  %v1350_v40 = vadd.f32 %v1277_v38, %v677_v34 }
 0x18b   : > { %1382 = vst [vmem:[#allocation2] sm:$0xff] %v1318_v39  ;;  %1414 = vst [vmem:[#allocation2 + $0x10] sm:$0xff] %v1350_v40 }
 0x18c   : > { %v1421_v41 = vld [vmem:[#allocation2 + $0xb0] sm:$0xff]  ;;  %v2360_v42 = vld [vmem:[%s2635_s2] ss:$0 sm:$0xff]  ;;  %v1423_v46 = vld [vmem:[#allocation2 + $0xd8] sm:$0xff] }
 0x18d   : > { %v1422_v43 = vld [vmem:[#allocation2 + $0x1b0] sm:$0xff]  ;;  %v1492_v44 = vadd.f32 %v2360_v42, %v1421_v41  ;;  %v1424_v47 = vld [vmem:[#allocation2 + $0x18] sm:$0xff]  ;;  %v1494_v49 = vadd.f32 %v2360_v42, %v1423_v46  ;;  %v1426_v52 = vld [vmem:[#allocation2 + $0x168] sm:$0xff] }
 0x18e   : > { %v1493_v45 = vadd.f32 %v2360_v42, %v1422_v43  ;;  %v1425_v48 = vld [vmem:[#allocation2 + $0x50] sm:$0xff]  ;;  %v1495_v50 = vadd.f32 %v2360_v42, %v1424_v47  ;;  %v1428_v54 = vld [vmem:[#allocation2 + $0x48] sm:$0xff]  ;;  %v1497_v55 = vadd.f32 %v2360_v42, %v1426_v52  ;;  %v1429_v58 = vld [vmem:[#allocation2 + $0x180] sm:$0xff] }
 0x18f   : > { %v1496_v51 = vadd.f32 %v2360_v42, %v1425_v48  ;;  %v1427_v53 = vld [vmem:[#allocation2 + $0x130] sm:$0xff]  ;;  %1556 = vst [vmem:[%s2636_s3] sm:$0xff] %v1492_v44  ;;  %v1499_v57 = vadd.f32 %v2360_v42, %v1428_v54  ;;  %v1431_v60 = vld [vmem:[#allocation2 + $0x118] sm:$0xff]  ;;  %1558 = vst [vmem:[%s2636_s3 + $0x10] sm:$0xff] %v1494_v49  ;;  %v1500_v61 = vadd.f32 %v2360_v42, %v1429_v58 }
 0x190   : > { %1557 = vst [vmem:[%s2636_s3 + $0x8] sm:$0xff] %v1493_v45  ;;  %v1498_v56 = vadd.f32 %v2360_v42, %v1427_v53  ;;  %v1430_v59 = vld [vmem:[#allocation2 + $0x110] sm:$0xff]  ;;  %1559 = vst [vmem:[%s2636_s3 + $0x18] sm:$0xff] %v1495_v50  ;;  %v1502_v63 = vadd.f32 %v2360_v42, %v1431_v60  ;;  %v1432_v0 = vld [vmem:[#allocation2 + $0x98] sm:$0xff] }
 0x191   : > { %1560 = vst [vmem:[%s2636_s3 + $0x20] sm:$0xff] %v1496_v51  ;;  %v1501_v62 = vadd.f32 %v2360_v42, %v1430_v59  ;;  %v1433_v1 = vld [vmem:[#allocation2 + $0x120] sm:$0xff]  ;;  %v1434_v2 = vld [vmem:[#allocation2 + $0x150] sm:$0xff]  ;;  %1561 = vst [vmem:[%s2636_s3 + $0x28] sm:$0xff] %v1497_v55  ;;  %v1503_v3 = vadd.f32 %v2360_v42, %v1432_v0 }
 0x192   : > { %1562 = vst [vmem:[%s2636_s3 + $0x30] sm:$0xff] %v1498_v56  ;;  %1563 = vst [vmem:[%s2636_s3 + $0x38] sm:$0xff] %v1499_v57  ;;  %v1504_v4 = vadd.f32 %v2360_v42, %v1433_v1  ;;  %v1505_v5 = vadd.f32 %v2360_v42, %v1434_v2  ;;  %v1435_v6 = vld [vmem:[#allocation2 + $0x108] sm:$0xff]  ;;  %v1436_v7 = vld [vmem:[#allocation2 + $0x60] sm:$0xff] }
 0x193   : > { %v1437_v8 = vld [vmem:[#allocation2 + $0xe0] sm:$0xff]  ;;  %1564 = vst [vmem:[%s2636_s3 + $0x40] sm:$0xff] %v1500_v61  ;;  %1565 = vst [vmem:[%s2636_s3 + $0x48] sm:$0xff] %v1501_v62  ;;  %v1506_v9 = vadd.f32 %v2360_v42, %v1435_v6  ;;  %v1507_v10 = vadd.f32 %v2360_v42, %v1436_v7  ;;  %v1438_v12 = vld [vmem:[#allocation2 + $0x188] sm:$0xff] }
 0x194   : > { %1566 = vst [vmem:[%s2636_s3 + $0x50] sm:$0xff] %v1502_v63  ;;  %v1508_v11 = vadd.f32 %v2360_v42, %v1437_v8  ;;  %v1439_v13 = vld [vmem:[#allocation2 + $0x138] sm:$0xff]  ;;  %v1440_v14 = vld [vmem:[#allocation2 + $0x140] sm:$0xff]  ;;  %1567 = vst [vmem:[%s2636_s3 + $0x58] sm:$0xff] %v1503_v3  ;;  %v1509_v15 = vadd.f32 %v2360_v42, %v1438_v12 }
 0x195   : > { %1568 = vst [vmem:[%s2636_s3 + $0x60] sm:$0xff] %v1504_v4  ;;  %1569 = vst [vmem:[%s2636_s3 + $0x68] sm:$0xff] %v1505_v5  ;;  %v1510_v16 = vadd.f32 %v2360_v42, %v1439_v13  ;;  %v1511_v17 = vadd.f32 %v2360_v42, %v1440_v14  ;;  %v1441_v18 = vld [vmem:[#allocation2 + $0x80] sm:$0xff]  ;;  %v1442_v19 = vld [vmem:[#allocation2 + $0x1a8] sm:$0xff] }
 0x196   : > { %v1443_v20 = vld [vmem:[#allocation2 + $0x1b8] sm:$0xff]  ;;  %1570 = vst [vmem:[%s2636_s3 + $0x70] sm:$0xff] %v1506_v9  ;;  %1571 = vst [vmem:[%s2636_s3 + $0x78] sm:$0xff] %v1507_v10  ;;  %v1512_v21 = vadd.f32 %v2360_v42, %v1441_v18  ;;  %v1513_v22 = vadd.f32 %v2360_v42, %v1442_v19  ;;  %v1444_v24 = vld [vmem:[#allocation2 + $0x28] sm:$0xff] }
 0x197   : > { %1572 = vst [vmem:[%s2636_s3 + $0x80] sm:$0xff] %v1508_v11  ;;  %v1514_v23 = vadd.f32 %v2360_v42, %v1443_v20  ;;  %v1445_v25 = vld [vmem:[#allocation2 + $0x1e8] sm:$0xff]  ;;  %v1446_v26 = vld [vmem:[#allocation2 + $0xf8] sm:$0xff]  ;;  %1573 = vst [vmem:[%s2636_s3 + $0x88] sm:$0xff] %v1509_v15  ;;  %v1515_v27 = vadd.f32 %v2360_v42, %v1444_v24 }
 0x198   : > { %1574 = vst [vmem:[%s2636_s3 + $0x90] sm:$0xff] %v1510_v16  ;;  %1575 = vst [vmem:[%s2636_s3 + $0x98] sm:$0xff] %v1511_v17  ;;  %v1516_v28 = vadd.f32 %v2360_v42, %v1445_v25  ;;  %v1517_v29 = vadd.f32 %v2360_v42, %v1446_v26  ;;  %v1447_v30 = vld [vmem:[#allocation2 + $0x160] sm:$0xff]  ;;  %v1448_v31 = vld [vmem:[#allocation2 + $0x30] sm:$0xff] }
 0x199   : > { %v1449_v32 = vld [vmem:[#allocation2 + $0x1e0] sm:$0xff]  ;;  %1576 = vst [vmem:[%s2636_s3 + $0xa0] sm:$0xff] %v1512_v21  ;;  %1577 = vst [vmem:[%s2636_s3 + $0xa8] sm:$0xff] %v1513_v22  ;;  %v1518_v33 = vadd.f32 %v2360_v42, %v1447_v30  ;;  %v1519_v34 = vadd.f32 %v2360_v42, %v1448_v31  ;;  %v1451_v37 = vld [vmem:[#allocation2 + $0xf0] sm:$0xff] }
 0x19a   : > { %1578 = vst [vmem:[%s2636_s3 + $0xb0] sm:$0xff] %v1514_v23  ;;  %v1520_v35 = vadd.f32 %v2360_v42, %v1449_v32  ;;  %v1450_v36 = vld [vmem:[#allocation2] sm:$0xff]  ;;  %v1452_v38 = vld [vmem:[#allocation2 + $0x8] sm:$0xff]  ;;  %1579 = vst [vmem:[%s2636_s3 + $0xb8] sm:$0xff] %v1515_v27  ;;  %v1522_v40 = vadd.f32 %v2360_v42, %v1451_v37 }
 0x19b   : > { %1580 = vst [vmem:[%s2636_s3 + $0xc0] sm:$0xff] %v1516_v28  ;;  %1581 = vst [vmem:[%s2636_s3 + $0xc8] sm:$0xff] %v1517_v29  ;;  %v1521_v39 = vadd.f32 %v2360_v42, %v1450_v36  ;;  %v1523_v41 = vadd.f32 %v2360_v42, %v1452_v38  ;;  %v1453_v43 = vld [vmem:[#allocation2 + $0x148] sm:$0xff]  ;;  %v1454_v44 = vld [vmem:[#allocation2 + $0x1d0] sm:$0xff] }
 0x19c   : > { %v1455_v45 = vld [vmem:[#allocation2 + $0x100] sm:$0xff]  ;;  %1582 = vst [vmem:[%s2636_s3 + $0xd0] sm:$0xff] %v1518_v33  ;;  %1583 = vst [vmem:[%s2636_s3 + $0xd8] sm:$0xff] %v1519_v34  ;;  %v1524_v46 = vadd.f32 %v2360_v42, %v1453_v43  ;;  %v1525_v47 = vadd.f32 %v2360_v42, %v1454_v44  ;;  %v1456_v49 = vld [vmem:[#allocation2 + $0xc8] sm:$0xff] }
 0x19d   : > { %1584 = vst [vmem:[%s2636_s3 + $0xe0] sm:$0xff] %v1520_v35  ;;  %v1526_v48 = vadd.f32 %v2360_v42, %v1455_v45  ;;  %v1457_v50 = vld [vmem:[#allocation2 + $0x40] sm:$0xff]  ;;  %v1458_v51 = vld [vmem:[#allocation2 + $0x1f8] sm:$0xff]  ;;  %1585 = vst [vmem:[%s2636_s3 + $0xe8] sm:$0xff] %v1521_v39  ;;  %v1527_v52 = vadd.f32 %v2360_v42, %v1456_v49 }
 0x19e   : > { %1586 = vst [vmem:[%s2636_s3 + $0xf0] sm:$0xff] %v1522_v40  ;;  %1587 = vst [vmem:[%s2636_s3 + $0xf8] sm:$0xff] %v1523_v41  ;;  %v1528_v53 = vadd.f32 %v2360_v42, %v1457_v50  ;;  %v1529_v54 = vadd.f32 %v2360_v42, %v1458_v51  ;;  %v1459_v55 = vld [vmem:[#allocation2 + $0x20] sm:$0xff]  ;;  %v1460_v56 = vld [vmem:[#allocation2 + $0x128] sm:$0xff] }
 0x19f   : > { %v1461_v57 = vld [vmem:[#allocation2 + $0x1a0] sm:$0xff]  ;;  %1588 = vst [vmem:[%s2636_s3 + $0x100] sm:$0xff] %v1524_v46  ;;  %1589 = vst [vmem:[%s2636_s3 + $0x108] sm:$0xff] %v1525_v47  ;;  %v1530_v58 = vadd.f32 %v2360_v42, %v1459_v55  ;;  %v1531_v59 = vadd.f32 %v2360_v42, %v1460_v56  ;;  %v1462_v61 = vld [vmem:[#allocation2 + $0x1f0] sm:$0xff] }
 0x1a0   : > { %1590 = vst [vmem:[%s2636_s3 + $0x110] sm:$0xff] %v1526_v48  ;;  %v1532_v60 = vadd.f32 %v2360_v42, %v1461_v57  ;;  %v1463_v62 = vld [vmem:[#allocation2 + $0xe8] sm:$0xff]  ;;  %v1464_v63 = vld [vmem:[#allocation2 + $0x78] sm:$0xff]  ;;  %1591 = vst [vmem:[%s2636_s3 + $0x118] sm:$0xff] %v1527_v52  ;;  %v1533_v0 = vadd.f32 %v2360_v42, %v1462_v61 }
 0x1a1   : > { %1592 = vst [vmem:[%s2636_s3 + $0x120] sm:$0xff] %v1528_v53  ;;  %1593 = vst [vmem:[%s2636_s3 + $0x128] sm:$0xff] %v1529_v54  ;;  %v1534_v1 = vadd.f32 %v2360_v42, %v1463_v62  ;;  %v1535_v2 = vadd.f32 %v2360_v42, %v1464_v63  ;;  %v1465_v3 = vld [vmem:[#allocation2 + $0x70] sm:$0xff]  ;;  %v1467_v5 = vld [vmem:[#allocation2 + $0x1d8] sm:$0xff] }
 0x1a2   : > { %v1466_v4 = vld [vmem:[#allocation2 + $0x90] sm:$0xff]  ;;  %1594 = vst [vmem:[%s2636_s3 + $0x130] sm:$0xff] %v1530_v58  ;;  %1595 = vst [vmem:[%s2636_s3 + $0x138] sm:$0xff] %v1531_v59  ;;  %v1536_v6 = vadd.f32 %v2360_v42, %v1465_v3  ;;  %v1538_v8 = vadd.f32 %v2360_v42, %v1467_v5  ;;  %v1469_v10 = vld [vmem:[#allocation2 + $0xb8] sm:$0xff] }
 0x1a3   : > { %1596 = vst [vmem:[%s2636_s3 + $0x140] sm:$0xff] %v1532_v60  ;;  %v1537_v7 = vadd.f32 %v2360_v42, %v1466_v4  ;;  %v1468_v9 = vld [vmem:[#allocation2 + $0xd0] sm:$0xff]  ;;  %v1470_v11 = vld [vmem:[#allocation2 + $0x88] sm:$0xff]  ;;  %1597 = vst [vmem:[%s2636_s3 + $0x148] sm:$0xff] %v1533_v0  ;;  %v1540_v13 = vadd.f32 %v2360_v42, %v1469_v10 }
 0x1a4   : > { %1598 = vst [vmem:[%s2636_s3 + $0x150] sm:$0xff] %v1534_v1  ;;  %1599 = vst [vmem:[%s2636_s3 + $0x158] sm:$0xff] %v1535_v2  ;;  %v1539_v12 = vadd.f32 %v2360_v42, %v1468_v9  ;;  %v1541_v14 = vadd.f32 %v2360_v42, %v1470_v11  ;;  %v1471_v15 = vld [vmem:[#allocation2 + $0xa8] sm:$0xff]  ;;  %v1473_v17 = vld [vmem:[#allocation2 + $0x170] sm:$0xff] }
 0x1a5   : > { %v1472_v16 = vld [vmem:[#allocation2 + $0x1c8] sm:$0xff]  ;;  %1600 = vst [vmem:[%s2636_s3 + $0x160] sm:$0xff] %v1536_v6  ;;  %1601 = vst [vmem:[%s2636_s3 + $0x168] sm:$0xff] %v1537_v7  ;;  %v1542_v18 = vadd.f32 %v2360_v42, %v1471_v15  ;;  %v1544_v20 = vadd.f32 %v2360_v42, %v1473_v17  ;;  %v1474_v21 = vld [vmem:[#allocation2 + $0x178] sm:$0xff] }
 0x1a6   : > { %1602 = vst [vmem:[%s2636_s3 + $0x170] sm:$0xff] %v1538_v8  ;;  %v1543_v19 = vadd.f32 %v2360_v42, %v1472_v16  ;;  %v1475_v22 = vld [vmem:[#allocation2 + $0x68] sm:$0xff]  ;;  %v1476_v23 = vld [vmem:[#allocation2 + $0x190] sm:$0xff]  ;;  %1603 = vst [vmem:[%s2636_s3 + $0x178] sm:$0xff] %v1539_v12  ;;  %v1545_v24 = vadd.f32 %v2360_v42, %v1474_v21 }
 0x1a7   : > { %1604 = vst [vmem:[%s2636_s3 + $0x180] sm:$0xff] %v1540_v13  ;;  %1605 = vst [vmem:[%s2636_s3 + $0x188] sm:$0xff] %v1541_v14  ;;  %v1546_v25 = vadd.f32 %v2360_v42, %v1475_v22  ;;  %v1547_v26 = vadd.f32 %v2360_v42, %v1476_v23  ;;  %v1477_v27 = vld [vmem:[#allocation2 + $0x198] sm:$0xff]  ;;  %v1479_v29 = vld [vmem:[#allocation2 + $0xc0] sm:$0xff] }
 0x1a8   : > { %v1478_v28 = vld [vmem:[#allocation2 + $0x38] sm:$0xff]  ;;  %1606 = vst [vmem:[%s2636_s3 + $0x190] sm:$0xff] %v1542_v18  ;;  %1607 = vst [vmem:[%s2636_s3 + $0x198] sm:$0xff] %v1543_v19  ;;  %v1548_v30 = vadd.f32 %v2360_v42, %v1477_v27  ;;  %v1550_v32 = vadd.f32 %v2360_v42, %v1479_v29  ;;  %v1480_v33 = vld [vmem:[#allocation2 + $0x1c0] sm:$0xff] }
 0x1a9   : > { %1608 = vst [vmem:[%s2636_s3 + $0x1a0] sm:$0xff] %v1544_v20  ;;  %v1549_v31 = vadd.f32 %v2360_v42, %v1478_v28  ;;  %v1481_v34 = vld [vmem:[#allocation2 + $0x158] sm:$0xff]  ;;  %v1482_v35 = vld [vmem:[#allocation2 + $0x10] sm:$0xff]  ;;  %1609 = vst [vmem:[%s2636_s3 + $0x1a8] sm:$0xff] %v1545_v24  ;;  %v1551_v36 = vadd.f32 %v2360_v42, %v1480_v33 }
 0x1aa   : > { %1610 = vst [vmem:[%s2636_s3 + $0x1b0] sm:$0xff] %v1546_v25  ;;  %1611 = vst [vmem:[%s2636_s3 + $0x1b8] sm:$0xff] %v1547_v26  ;;  %v1552_v37 = vadd.f32 %v2360_v42, %v1481_v34  ;;  %v1553_v38 = vadd.f32 %v2360_v42, %v1482_v35  ;;  %v1483_v39 = vld [vmem:[#allocation2 + $0x58] sm:$0xff]  ;;  %v1484_v40 = vld [vmem:[#allocation2 + $0xa0] sm:$0xff] }
 0x1ab   : > { %1612 = vst [vmem:[%s2636_s3 + $0x1c0] sm:$0xff] %v1548_v30  ;;  %1613 = vst [vmem:[%s2636_s3 + $0x1c8] sm:$0xff] %v1549_v31  ;;  %v1554_v41 = vadd.f32 %v2360_v42, %v1483_v39  ;;  %v1555_v43 = vadd.f32 %v2360_v42, %v1484_v40 }
 0x1ac   : > { %1614 = vst [vmem:[%s2636_s3 + $0x1d0] sm:$0xff] %v1550_v32  ;;  %1615 = vst [vmem:[%s2636_s3 + $0x1d8] sm:$0xff] %v1551_v36 }
 0x1ad   : > { %1616 = vst [vmem:[%s2636_s3 + $0x1e0] sm:$0xff] %v1552_v37  ;;  %1617 = vst [vmem:[%s2636_s3 + $0x1e8] sm:$0xff] %v1553_v38 }
 0x1ae   : > { %1618 = vst [vmem:[%s2636_s3 + $0x1f0] sm:$0xff] %v1554_v41  ;;  %1619 = vst [vmem:[%s2636_s3 + $0x1f8] sm:$0xff] %v1555_v43 }
 0x1af PF: > { %s13_s16 = sadd.s32 1, %s2042_s16   ;;  %s2637_s12 = smov %s2030_s13 }
 0x1b0   : > { %p10_p12 = scmp.ge.s32.totalorder %s13_s16, 4   ;;  %s2638_s13 = smov %s2100_s20 }
 0x1b1   : > { %s2639_s14 = smov %s2038_s15  ;;  %s2640_s15 = smov %s2642_s17 }
 0x1b2   :  { %12 = sbr.rel (!%p10_p12) target bundleno = 3 (0x3), region = 122 }

</bundles_post_ra>
